<compile_context>
chip_gen: v7x
topology: tpu7x:2x2x1
jax: 0.10.0
libtpu: 0.0.40
codegen_flags: <defaults>
</compile_context>

<pallas_src>
import math

import jax
import jax.numpy as jnp
from jax.experimental import pallas as pl
from jax.experimental.pallas import tpu as pltpu

BLOCK_SIZE = 8        # T
EMB_SIZE = 10
BATCH_SIZE = 4
CHANNEL_SIZE = 10
BN_EPS = 1e-5
LANES = 128           # every channel dim is padded to one full lane tile
ODD_LANE_OFFSET = LANES // 2   # roll by exactly half the lanes: the result is
                               # identical for either roll-direction convention


def make_fused_kernel(n_rows, num_layers):
    """Fused kernel: all log2(T) layers in one invocation, activations on-chip.

    x_ref : (n_rows, 128)            padded input rows (row = b*T + t)
    w_ref : (num_layers, 128, 128)   packed Linear weights:
                                       rows [0:C)        -> even-step channels
                                       rows [64:64+C)    -> odd-step channels
    b_ref : (num_layers, 1, 128)     padded biases
    o_ref : (n_rows, 128)            valid rows of layer l sit at i % 2**(l+1)==0
    """

    def kernel(x_ref, w_ref, b_ref, o_ref):
        x = x_ref[...]                                    # (n, 128) f32
        row_idx = jax.lax.broadcasted_iota(jnp.int32, (n_rows, LANES), 0)

        for l in range(num_layers):                       # statically unrolled
            stride = 1 << l          # row distance between the two pair members
            n_valid = n_rows >> (l + 1)

            # partner[i] = x[i + stride]  (sublane rotate, XLU slot - free-ish)
            partner = pltpu.roll(x, shift=n_rows - stride, axis=0)
            # park partner's channels at lanes [64:64+C) (lane rotate by half
            # the lane count -> direction-convention independent).
            partner = pltpu.roll(partner, shift=ODD_LANE_OFFSET, axis=1)
            combined = x + partner    # [even ch | 0 ... | odd ch | 0 ...]

            # ONE fused Linear matmul per layer (even+odd halves packed in W).
            y = jnp.dot(combined, w_ref[l],
                        preferred_element_type=jnp.float32,
                        precision=jax.lax.Precision.HIGHEST) + b_ref[l]

            # BatchNorm1d (training mode, gamma=1, beta=0): segmented stats
            # over the valid rows only; don't-care rows are masked out and
            # never propagate into a valid row downstream.
            mask = (row_idx % (2 * stride) == 0).astype(jnp.float32)
            inv_n = 1.0 / float(n_valid)
            mean = jnp.sum(y * mask, axis=0, keepdims=True) * inv_n
            centered = y - mean
            var = jnp.sum(centered * centered * mask, axis=0,
                          keepdims=True) * inv_n
            x = jnp.tanh(centered * jax.lax.rsqrt(var + BN_EPS))

        o_ref[...] = x                # (32, 128): fully unmasked tile stores

    return kernel


def init_params(key, block_size, emb_size, channel_size):
    """Deterministic params mimicking nn.Linear default init (U[-k, k])."""
    params = []
    c = channel_size
    t = block_size
    while t != 1:
        fan_in = c * 2
        key, kw, kb = jax.random.split(key, 3)
        bound = 1.0 / math.sqrt(float(fan_in))
        w = jax.random.uniform(kw, (emb_size, fan_in), jnp.float32, -bound, bound)
        b = jax.random.uniform(kb, (emb_size,), jnp.float32, -bound, bound)
        params.append((w, b))
        t //= 2
        c = emb_size
    return params


def pack_params(params):
    """One-time packing: transpose, place even/odd halves at sublanes 0 / 64."""
    ws, bs = [], []
    for w, b in params:
        emb, fan_in = w.shape
        cin = fan_in // 2
        wt = w.T                                           # (2*cin, emb)
        wp = jnp.zeros((LANES, LANES), jnp.float32)
        wp = wp.at[:cin, :emb].set(wt[:cin])                       # even step
        wp = wp.at[ODD_LANE_OFFSET:ODD_LANE_OFFSET + cin, :emb].set(wt[cin:])
        bp = jnp.zeros((1, LANES), jnp.float32).at[0, :emb].set(b)
        ws.append(wp)
        bs.append(bp)
    return jnp.stack(ws), jnp.stack(bs)


def wavenet_forward(x, w_stack, b_stack):
    """x: (B, T, C) f32 -> (B, 1, emb) f32 via one fused Pallas kernel."""
    B, T, C = x.shape
    num_layers = w_stack.shape[0]
    assert T == 2 ** num_layers, "T must be 2**num_layers"
    n_rows = B * T

    # Lane-pad the input once (fused into surrounding XLA under jit).
    x_pad = jnp.zeros((n_rows, LANES), jnp.float32).at[:, :C].set(
        x.reshape(n_rows, C))

    out_pad = pl.pallas_call(
        make_fused_kernel(n_rows, num_layers),
        out_shape=jax.ShapeDtypeStruct((n_rows, LANES), jnp.float32),
        in_specs=[pl.BlockSpec(memory_space=pltpu.MemorySpace.VMEM)
                  for _ in range(3)],
        out_specs=pl.BlockSpec(memory_space=pltpu.MemorySpace.VMEM),
    )(x_pad, w_stack, b_stack)

    # After num_layers reductions the valid rows sit at i = b*T (t' == 0).
    return out_pad[::T, :EMB_SIZE].reshape(B, 1, EMB_SIZE)


wavenet_forward_jit = jax.jit(wavenet_forward)


if __name__ == "__main__":
    key = jax.random.PRNGKey(0)
    k_x, k_p = jax.random.split(key)

    x = jax.random.normal(k_x, (BATCH_SIZE, BLOCK_SIZE, CHANNEL_SIZE), jnp.float32)
    params = init_params(k_p, BLOCK_SIZE, EMB_SIZE, CHANNEL_SIZE)
    w_stack, b_stack = pack_params(params)            # hoisted to init

    out = wavenet_forward_jit(x, w_stack, b_stack)
    out = jax.block_until_ready(out)

    # Pure-JAX reference with the same semantics (PyTorch module at default
    # init: Linear -> BatchNorm1d(train, gamma=1, beta=0) -> tanh per layer).
    def ref_forward(x, params):
        B, T, C = x.shape
        layer = 0
        while T != 1:
            x = x.reshape(B, T // 2, C * 2)
            w, b = params[layer]
            y = jnp.einsum("btc,ec->bte", x, w,
                           precision=jax.lax.Precision.HIGHEST) + b
            mean = jnp.mean(y, axis=(0, 1), keepdims=True)
            var = jnp.mean((y - mean) ** 2, axis=(0, 1), keepdims=True)
            x = jnp.tanh((y - mean) / jnp.sqrt(var + BN_EPS))
            B, T, C = x.shape
            layer += 1
        return x

    ref = ref_forward(x, params)
    assert out.shape == (BATCH_SIZE, 1, EMB_SIZE), out.shape
    assert jnp.allclose(out, ref, atol=2e-4, rtol=2e-4), (
        float(jnp.max(jnp.abs(out - ref))))

    print("KERNEL_OK")
</pallas_src>

<mosaic_0001>
module attributes {stable_mosaic.version = 11 : i64} {
  func.func @kernel(%arg0: memref<32x128xf32, #tpu.memory_space<vmem>>, %arg1: memref<3x128x128xf32, #tpu.memory_space<vmem>>, %arg2: memref<3x1x128xf32, #tpu.memory_space<vmem>>, %arg3: memref<32x128xf32, #tpu.memory_space<vmem>>) attributes {dimension_semantics = [], scalar_prefetch = 0 : i64, scratch_operands = 0 : i64, tpu.core_type = #tpu.core_type<tc>} {
    %c0 = arith.constant 0 : index
    %c0_0 = arith.constant 0 : index
    %0 = vector.load %arg0[%c0, %c0_0] : memref<32x128xf32, #tpu.memory_space<vmem>>, vector<32x128xf32>
    %1 = tpu.iota {dimensions = array<i32: 0>} : vector<32x128xi32>
    %c31_i32 = arith.constant 31 : i32
    %2 = tpu.dynamic_rotate %0 by %c31_i32 dim 0 : vector<32x128xf32>, i32 -> vector<32x128xf32>
    %c64_i32 = arith.constant 64 : i32
    %3 = tpu.dynamic_rotate %2 by %c64_i32 dim 1 : vector<32x128xf32>, i32 -> vector<32x128xf32>
    %4 = arith.addf %0, %3 : vector<32x128xf32>
    %c0_1 = arith.constant 0 : index
    %c0_2 = arith.constant 0 : index
    %c0_3 = arith.constant 0 : index
    %5 = vector.load %arg1[%c0_1, %c0_2, %c0_3] : memref<3x128x128xf32, #tpu.memory_space<vmem>>, vector<1x128x128xf32>
    %6 = vector.shape_cast %5 : vector<1x128x128xf32> to vector<128x128xf32>
    %cst = arith.constant dense<0.000000e+00> : vector<32x128xf32>
    %7 = tpu.matmul %4, %6, %cst {dimension_numbers = #tpu.dot_dimension_numbers<[1], [0], [0], [1], [0, 0, 1, 1], [], []>, precision = #tpu.contract_precision<fp32>} : vector<32x128xf32>, vector<128x128xf32>, vector<32x128xf32> -> vector<32x128xf32>
    %c0_4 = arith.constant 0 : index
    %c0_5 = arith.constant 0 : index
    %c0_6 = arith.constant 0 : index
    %8 = vector.load %arg2[%c0_4, %c0_5, %c0_6] : memref<3x1x128xf32, #tpu.memory_space<vmem>>, vector<1x1x128xf32>
    %9 = vector.shape_cast %8 : vector<1x1x128xf32> to vector<1x128xf32>
    %10 = vector.broadcast %9 : vector<1x128xf32> to vector<32x128xf32>
    %11 = arith.addf %7, %10 : vector<32x128xf32>
    %c2_i32 = arith.constant 2 : i32
    %c0_i32 = arith.constant 0 : i32
    %12 = arith.cmpi eq, %c2_i32, %c0_i32 : i32
    %c1_i32 = arith.constant 1 : i32
    %13 = arith.select %12, %c1_i32, %c2_i32 : i32
    %14 = vector.broadcast %13 : i32 to vector<32x128xi32>
    %15 = arith.remsi %1, %14 : vector<32x128xi32>
    %c0_i32_7 = arith.constant 0 : i32
    %16 = vector.broadcast %c0_i32_7 : i32 to vector<32x128xi32>
    %17 = arith.cmpi ne, %15, %16 : vector<32x128xi32>
    %c0_i32_8 = arith.constant 0 : i32
    %18 = vector.broadcast %c0_i32_8 : i32 to vector<32x128xi32>
    %19 = arith.cmpi slt, %15, %18 : vector<32x128xi32>
    %c0_i32_9 = arith.constant 0 : i32
    %20 = arith.cmpi slt, %13, %c0_i32_9 : i32
    %21 = vector.broadcast %20 : i1 to vector<32x128xi1>
    %22 = vector.broadcast %21 : vector<32x128xi1> to vector<32x128xi1>
    %23 = arith.xori %19, %22 : vector<32x128xi1>
    %24 = arith.andi %23, %17 : vector<32x128xi1>
    %25 = vector.broadcast %13 : i32 to vector<32x128xi32>
    %26 = arith.addi %15, %25 : vector<32x128xi32>
    %27 = arith.select %24, %26, %15 : vector<32x128xi1>, vector<32x128xi32>
    %c0_i32_10 = arith.constant 0 : i32
    %28 = vector.broadcast %c0_i32_10 : i32 to vector<32x128xi32>
    %29 = arith.cmpi eq, %27, %28 : vector<32x128xi32>
    %30 = arith.extui %29 : vector<32x128xi1> to vector<32x128xi32>
    %31 = arith.sitofp %30 : vector<32x128xi32> to vector<32x128xf32>
    %32 = arith.mulf %11, %31 : vector<32x128xf32>
    %cst_11 = arith.constant dense<0.000000e+00> : vector<128xf32>
    %33 = vector.multi_reduction <add>, %32, %cst_11 [0] : vector<32x128xf32> to vector<128xf32>
    %34 = vector.shape_cast %33 : vector<128xf32> to vector<1x128xf32>
    %cst_12 = arith.constant 6.250000e-02 : f32
    %35 = vector.broadcast %cst_12 : f32 to vector<1x128xf32>
    %36 = arith.mulf %34, %35 : vector<1x128xf32>
    %37 = vector.broadcast %36 : vector<1x128xf32> to vector<32x128xf32>
    %38 = arith.subf %11, %37 : vector<32x128xf32>
    %39 = arith.mulf %38, %38 : vector<32x128xf32>
    %40 = arith.mulf %39, %31 : vector<32x128xf32>
    %cst_13 = arith.constant dense<0.000000e+00> : vector<128xf32>
    %41 = vector.multi_reduction <add>, %40, %cst_13 [0] : vector<32x128xf32> to vector<128xf32>
    %42 = vector.shape_cast %41 : vector<128xf32> to vector<1x128xf32>
    %cst_14 = arith.constant 6.250000e-02 : f32
    %43 = vector.broadcast %cst_14 : f32 to vector<1x128xf32>
    %44 = arith.mulf %42, %43 : vector<1x128xf32>
    %cst_15 = arith.constant 9.99999974E-6 : f32
    %45 = vector.broadcast %cst_15 : f32 to vector<1x128xf32>
    %46 = arith.addf %44, %45 : vector<1x128xf32>
    %47 = math.rsqrt %46 : vector<1x128xf32>
    %48 = vector.broadcast %47 : vector<1x128xf32> to vector<32x128xf32>
    %49 = arith.mulf %38, %48 : vector<32x128xf32>
    %50 = math.tanh %49 : vector<32x128xf32>
    %c30_i32 = arith.constant 30 : i32
    %51 = tpu.dynamic_rotate %50 by %c30_i32 dim 0 : vector<32x128xf32>, i32 -> vector<32x128xf32>
    %c64_i32_16 = arith.constant 64 : i32
    %52 = tpu.dynamic_rotate %51 by %c64_i32_16 dim 1 : vector<32x128xf32>, i32 -> vector<32x128xf32>
    %53 = arith.addf %50, %52 : vector<32x128xf32>
    %c1 = arith.constant 1 : index
    %c0_17 = arith.constant 0 : index
    %c0_18 = arith.constant 0 : index
    %54 = vector.load %arg1[%c1, %c0_17, %c0_18] : memref<3x128x128xf32, #tpu.memory_space<vmem>>, vector<1x128x128xf32>
    %55 = vector.shape_cast %54 : vector<1x128x128xf32> to vector<128x128xf32>
    %cst_19 = arith.constant dense<0.000000e+00> : vector<32x128xf32>
    %56 = tpu.matmul %53, %55, %cst_19 {dimension_numbers = #tpu.dot_dimension_numbers<[1], [0], [0], [1], [0, 0, 1, 1], [], []>, precision = #tpu.contract_precision<fp32>} : vector<32x128xf32>, vector<128x128xf32>, vector<32x128xf32> -> vector<32x128xf32>
    %c1_20 = arith.constant 1 : index
    %c0_21 = arith.constant 0 : index
    %c0_22 = arith.constant 0 : index
    %57 = vector.load %arg2[%c1_20, %c0_21, %c0_22] : memref<3x1x128xf32, #tpu.memory_space<vmem>>, vector<1x1x128xf32>
    %58 = vector.shape_cast %57 : vector<1x1x128xf32> to vector<1x128xf32>
    %59 = vector.broadcast %58 : vector<1x128xf32> to vector<32x128xf32>
    %60 = arith.addf %56, %59 : vector<32x128xf32>
    %c4_i32 = arith.constant 4 : i32
    %c0_i32_23 = arith.constant 0 : i32
    %61 = arith.cmpi eq, %c4_i32, %c0_i32_23 : i32
    %c1_i32_24 = arith.constant 1 : i32
    %62 = arith.select %61, %c1_i32_24, %c4_i32 : i32
    %63 = vector.broadcast %62 : i32 to vector<32x128xi32>
    %64 = arith.remsi %1, %63 : vector<32x128xi32>
    %c0_i32_25 = arith.constant 0 : i32
    %65 = vector.broadcast %c0_i32_25 : i32 to vector<32x128xi32>
    %66 = arith.cmpi ne, %64, %65 : vector<32x128xi32>
    %c0_i32_26 = arith.constant 0 : i32
    %67 = vector.broadcast %c0_i32_26 : i32 to vector<32x128xi32>
    %68 = arith.cmpi slt, %64, %67 : vector<32x128xi32>
    %c0_i32_27 = arith.constant 0 : i32
    %69 = arith.cmpi slt, %62, %c0_i32_27 : i32
    %70 = vector.broadcast %69 : i1 to vector<32x128xi1>
    %71 = vector.broadcast %70 : vector<32x128xi1> to vector<32x128xi1>
    %72 = arith.xori %68, %71 : vector<32x128xi1>
    %73 = arith.andi %72, %66 : vector<32x128xi1>
    %74 = vector.broadcast %62 : i32 to vector<32x128xi32>
    %75 = arith.addi %64, %74 : vector<32x128xi32>
    %76 = arith.select %73, %75, %64 : vector<32x128xi1>, vector<32x128xi32>
    %c0_i32_28 = arith.constant 0 : i32
    %77 = vector.broadcast %c0_i32_28 : i32 to vector<32x128xi32>
    %78 = arith.cmpi eq, %76, %77 : vector<32x128xi32>
    %79 = arith.extui %78 : vector<32x128xi1> to vector<32x128xi32>
    %80 = arith.sitofp %79 : vector<32x128xi32> to vector<32x128xf32>
    %81 = arith.mulf %60, %80 : vector<32x128xf32>
    %cst_29 = arith.constant dense<0.000000e+00> : vector<128xf32>
    %82 = vector.multi_reduction <add>, %81, %cst_29 [0] : vector<32x128xf32> to vector<128xf32>
    %83 = vector.shape_cast %82 : vector<128xf32> to vector<1x128xf32>
    %cst_30 = arith.constant 1.250000e-01 : f32
    %84 = vector.broadcast %cst_30 : f32 to vector<1x128xf32>
    %85 = arith.mulf %83, %84 : vector<1x128xf32>
    %86 = vector.broadcast %85 : vector<1x128xf32> to vector<32x128xf32>
    %87 = arith.subf %60, %86 : vector<32x128xf32>
    %88 = arith.mulf %87, %87 : vector<32x128xf32>
    %89 = arith.mulf %88, %80 : vector<32x128xf32>
    %cst_31 = arith.constant dense<0.000000e+00> : vector<128xf32>
    %90 = vector.multi_reduction <add>, %89, %cst_31 [0] : vector<32x128xf32> to vector<128xf32>
    %91 = vector.shape_cast %90 : vector<128xf32> to vector<1x128xf32>
    %cst_32 = arith.constant 1.250000e-01 : f32
    %92 = vector.broadcast %cst_32 : f32 to vector<1x128xf32>
    %93 = arith.mulf %91, %92 : vector<1x128xf32>
    %cst_33 = arith.constant 9.99999974E-6 : f32
    %94 = vector.broadcast %cst_33 : f32 to vector<1x128xf32>
    %95 = arith.addf %93, %94 : vector<1x128xf32>
    %96 = math.rsqrt %95 : vector<1x128xf32>
    %97 = vector.broadcast %96 : vector<1x128xf32> to vector<32x128xf32>
    %98 = arith.mulf %87, %97 : vector<32x128xf32>
    %99 = math.tanh %98 : vector<32x128xf32>
    %c28_i32 = arith.constant 28 : i32
    %100 = tpu.dynamic_rotate %99 by %c28_i32 dim 0 : vector<32x128xf32>, i32 -> vector<32x128xf32>
    %c64_i32_34 = arith.constant 64 : i32
    %101 = tpu.dynamic_rotate %100 by %c64_i32_34 dim 1 : vector<32x128xf32>, i32 -> vector<32x128xf32>
    %102 = arith.addf %99, %101 : vector<32x128xf32>
    %c2 = arith.constant 2 : index
    %c0_35 = arith.constant 0 : index
    %c0_36 = arith.constant 0 : index
    %103 = vector.load %arg1[%c2, %c0_35, %c0_36] : memref<3x128x128xf32, #tpu.memory_space<vmem>>, vector<1x128x128xf32>
    %104 = vector.shape_cast %103 : vector<1x128x128xf32> to vector<128x128xf32>
    %cst_37 = arith.constant dense<0.000000e+00> : vector<32x128xf32>
    %105 = tpu.matmul %102, %104, %cst_37 {dimension_numbers = #tpu.dot_dimension_numbers<[1], [0], [0], [1], [0, 0, 1, 1], [], []>, precision = #tpu.contract_precision<fp32>} : vector<32x128xf32>, vector<128x128xf32>, vector<32x128xf32> -> vector<32x128xf32>
    %c2_38 = arith.constant 2 : index
    %c0_39 = arith.constant 0 : index
    %c0_40 = arith.constant 0 : index
    %106 = vector.load %arg2[%c2_38, %c0_39, %c0_40] : memref<3x1x128xf32, #tpu.memory_space<vmem>>, vector<1x1x128xf32>
    %107 = vector.shape_cast %106 : vector<1x1x128xf32> to vector<1x128xf32>
    %108 = vector.broadcast %107 : vector<1x128xf32> to vector<32x128xf32>
    %109 = arith.addf %105, %108 : vector<32x128xf32>
    %c8_i32 = arith.constant 8 : i32
    %c0_i32_41 = arith.constant 0 : i32
    %110 = arith.cmpi eq, %c8_i32, %c0_i32_41 : i32
    %c1_i32_42 = arith.constant 1 : i32
    %111 = arith.select %110, %c1_i32_42, %c8_i32 : i32
    %112 = vector.broadcast %111 : i32 to vector<32x128xi32>
    %113 = arith.remsi %1, %112 : vector<32x128xi32>
    %c0_i32_43 = arith.constant 0 : i32
    %114 = vector.broadcast %c0_i32_43 : i32 to vector<32x128xi32>
    %115 = arith.cmpi ne, %113, %114 : vector<32x128xi32>
    %c0_i32_44 = arith.constant 0 : i32
    %116 = vector.broadcast %c0_i32_44 : i32 to vector<32x128xi32>
    %117 = arith.cmpi slt, %113, %116 : vector<32x128xi32>
    %c0_i32_45 = arith.constant 0 : i32
    %118 = arith.cmpi slt, %111, %c0_i32_45 : i32
    %119 = vector.broadcast %118 : i1 to vector<32x128xi1>
    %120 = vector.broadcast %119 : vector<32x128xi1> to vector<32x128xi1>
    %121 = arith.xori %117, %120 : vector<32x128xi1>
    %122 = arith.andi %121, %115 : vector<32x128xi1>
    %123 = vector.broadcast %111 : i32 to vector<32x128xi32>
    %124 = arith.addi %113, %123 : vector<32x128xi32>
    %125 = arith.select %122, %124, %113 : vector<32x128xi1>, vector<32x128xi32>
    %c0_i32_46 = arith.constant 0 : i32
    %126 = vector.broadcast %c0_i32_46 : i32 to vector<32x128xi32>
    %127 = arith.cmpi eq, %125, %126 : vector<32x128xi32>
    %128 = arith.extui %127 : vector<32x128xi1> to vector<32x128xi32>
    %129 = arith.sitofp %128 : vector<32x128xi32> to vector<32x128xf32>
    %130 = arith.mulf %109, %129 : vector<32x128xf32>
    %cst_47 = arith.constant dense<0.000000e+00> : vector<128xf32>
    %131 = vector.multi_reduction <add>, %130, %cst_47 [0] : vector<32x128xf32> to vector<128xf32>
    %132 = vector.shape_cast %131 : vector<128xf32> to vector<1x128xf32>
    %cst_48 = arith.constant 2.500000e-01 : f32
    %133 = vector.broadcast %cst_48 : f32 to vector<1x128xf32>
    %134 = arith.mulf %132, %133 : vector<1x128xf32>
    %135 = vector.broadcast %134 : vector<1x128xf32> to vector<32x128xf32>
    %136 = arith.subf %109, %135 : vector<32x128xf32>
    %137 = arith.mulf %136, %136 : vector<32x128xf32>
    %138 = arith.mulf %137, %129 : vector<32x128xf32>
    %cst_49 = arith.constant dense<0.000000e+00> : vector<128xf32>
    %139 = vector.multi_reduction <add>, %138, %cst_49 [0] : vector<32x128xf32> to vector<128xf32>
    %140 = vector.shape_cast %139 : vector<128xf32> to vector<1x128xf32>
    %cst_50 = arith.constant 2.500000e-01 : f32
    %141 = vector.broadcast %cst_50 : f32 to vector<1x128xf32>
    %142 = arith.mulf %140, %141 : vector<1x128xf32>
    %cst_51 = arith.constant 9.99999974E-6 : f32
    %143 = vector.broadcast %cst_51 : f32 to vector<1x128xf32>
    %144 = arith.addf %142, %143 : vector<1x128xf32>
    %145 = math.rsqrt %144 : vector<1x128xf32>
    %146 = vector.broadcast %145 : vector<1x128xf32> to vector<32x128xf32>
    %147 = arith.mulf %136, %146 : vector<32x128xf32>
    %148 = math.tanh %147 : vector<32x128xf32>
    %c0_52 = arith.constant 0 : index
    %c0_53 = arith.constant 0 : index
    %149 = vector.load %arg3[%c0_52, %c0_53] : memref<32x128xf32, #tpu.memory_space<vmem>>, vector<32x128xf32>
    tpu.vector_store %arg3[%c0_52, %c0_53], %148 {strides = array<i32>} : memref<32x128xf32, #tpu.memory_space<vmem>>, vector<32x128xf32>,
    return
  }
}

</mosaic_0001>

<bundles_post_ra>
// kernel: wavenet_forward.1
= control target key start
LH: loop header
LB: loop body
LE: loop exit
PB: predicated region body
PF: predicated region fallthrough
CT: control target
= control target key end

     0   :  { %8 = vsyncpa [#allocation3], 0  ;;  %s4578_s12 = smov [#allocation2]   ;;  %s5835_s0 = inlined_call_operand.vmem [shape: f32[32,128], index: 0, kind: input, shape index: {}]   ;;  %s5836_s1 = inlined_call_operand.hbm [shape: f32[3,128,128], index: 1, kind: input, shape index: {}]   ;;  %s5837_s2 = inlined_call_operand.vmem [shape: f32[3,1,128], index: 2, kind: input, shape index: {}]   ;;  %s5838_s3 = inlined_call_operand.vmem [shape: f32[32,128], index: 3, kind: output, shape index: {}]  }
   0x1   :  { %s16_s13 = sshll.u32 %s4578_s12, 4  ;;  %s4554_s16 = scalar_lea.hbm %s5836_s1, 6144  ;;  %s17_s13 = int_to_ptr.vmem [resolvable:$true] %s16_s13 }
   0x2   :  { %p4555_p0 = scmp.ne.s32.totalorder %s5836_s1, %s4554_s16  ;;  %p4558_p1 = scmp.lt.u32.totalorder %s4554_s16, %s5836_s1 }
   0x4   :  { %p4560_p2 = pnand %p4558_p1, %p4555_p0 }
   0x6   :  { %4563 = shalt.err (!%p4560_p2)
}
   0x7   :  { %s4564_s21 = scalar_lea.vmem %s17_s13, 6144  ;;  %p4569_p4 = scmp.lt.s32.totalorder %s17_s13, %s17_s13 }
   0x8   :  { %p4565_p3 = scmp.ne.s32.totalorder %s17_s13, %s4564_s21  ;;  %p4570_p5 = scmp.lt.s32.totalorder %s4564_s21, %s4564_s21 }
   0xa   :  { %p4571_p6 = por %p4570_p5, %p4569_p4 }
   0xc   :  { %p4572_p7 = pnand %p4571_p6, %p4565_p3 }
   0xe   :  { %4575 = shalt.err (!%p4572_p7)
}
   0xf   :  { %s4579_s22 = smov 128   ;;  %s4580_s23 = smov 8  }
  0x10   :  { %22 = dma.hbm_to_vmem [thread:$0]  %s5836_s1, 6144, %s17_s13, [#allocation3], %s4579_s22, %s4579_s22, %s4580_s23  }
  0x11   :  { %4576 = dma.done.wait [#allocation3], 6144  }
  0x12   :  { %4577 = vsyncadd [#allocation3], 4294961152  ;;  %v32_v0 = vlaneseq  ;;  %v4620_v2 = vld [vmem:[%s5835_s0] sm:$0xff]  ;;  %v4625_v3 = vld [vmem:[%s5835_s0 + $0x8] sm:$0xff] }
  0x13   :  { %v4631_v4 = vld [vmem:[%s5835_s0 + $0x10] sm:$0xff]  ;;  %v37_v5 = vrot.slane %v4620_v2, 1  ;;  %v38_v6 = vrot.slane %v4625_v3, 1  ;;  %v4638_v7 = vld [vmem:[%s5835_s0 + $0x18] sm:$0xff]  ;;  %v58_v9 = vld [vmem:[#allocation2] sm:$0xff]  ;;  %s4581_s0 = smov 64  }
  0x14   :  { %v4615_v1 = vshrl.u32 %v32_v0, 7  ;;  %v39_v8 = vrot.slane %v4631_v4, 1  ;;  %v59_v10 = vld [vmem:[#allocation2 + $0x8] sm:$0xff]  ;;  %v40_v11 = vrot.slane %v4638_v7, 1  ;;  %v82_v12 = vand.u32 4294901760, %v58_v9  ;;  %v60_v14 = vld [vmem:[#allocation2 + $0x10] sm:$0xff] }
  0x15   :  { %v85_v13 = vand.u32 4294901760, %v59_v10  ;;  %v61_v15 = vld [vmem:[#allocation2 + $0x18] sm:$0xff]  ;;  %v62_v16 = vld [vmem:[#allocation2 + $0x20] sm:$0xff]  ;;  %v88_v18 = vand.u32 4294901760, %v60_v14  ;;  %v63_v20 = vld [vmem:[#allocation2 + $0x28] sm:$0xff] }
  0x16   :  { %vm41_vm0 = vcmp.lt.s32.totalorder %v4615_v1, 7  ;;  %v91_v19 = vand.u32 4294901760, %v61_v15  ;;  %v64_v21 = vld [vmem:[#allocation2 + $0x30] sm:$0xff]  ;;  %v65_v22 = vld [vmem:[#allocation2 + $0x38] sm:$0xff]  ;;  %v94_v26 = vand.u32 4294901760, %v62_v16  ;;  %v4651_v27 = vld [vmem:[#allocation2 + $0x40] sm:$0xff]  ;;  %v4686_v46 = vsub.f32 %v58_v9, %v82_v12 }
  0x17   :  { %v44_v17 = vsel %vm41_vm0, %v37_v5, %v38_v6  ;;  %v42_v23 = vsel %vm41_vm0, %v39_v8, %v40_v11  ;;  %v43_v24 = vsel %vm41_vm0, %v38_v6, %v39_v8  ;;  %v4649_v25 = vpack.c.bf16 %v85_v13, %v82_v12  ;;  %v4653_v28 = vld [vmem:[#allocation2 + $0x48] sm:$0xff]  ;;  %v4655_v29 = vld [vmem:[#allocation2 + $0x50] sm:$0xff]  ;;  %v4660_v34 = vld [vmem:[#allocation2 + $0x58] sm:$0xff] }
  0x18   :  { %46 = vrot.lane.b32.xlu0 %v44_v17, %s4581_s0  ;;  %50 = vrot.lane.b32.xlu1 %v42_v23, %s4581_s0  ;;  %v4658_v30 = vpack.c.bf16 %v91_v19, %v88_v18  ;;  %v97_v31 = vand.u32 4294901760, %v63_v20  ;;  %v100_v32 = vand.u32 4294901760, %v64_v21  ;;  %v103_v33 = vand.u32 4294901760, %v65_v22  ;;  %v4668_v38 = vld [vmem:[#allocation2 + $0x60] sm:$0xff]  ;;  %v4670_v39 = vld [vmem:[#allocation2 + $0x68] sm:$0xff]  ;;  %v4692_v49 = vld [vmem:[#allocation2 + $0x70] sm:$0xff] }
  0x19   :  { %v45_v35 = vsel %vm41_vm0, %v40_v11, %v37_v5  ;;  %3968 = vmatprep.subr.bf16.mxu0 %v4649_v25  ;;  %3872 = vmatprep.subr.bf16.mxu1 %v4649_v25  ;;  %v106_v36 = vand.u32 4294901760, %v4651_v27  ;;  %v109_v37 = vand.u32 4294901760, %v4653_v28  ;;  %v112_v40 = vand.u32 4294901760, %v4655_v29  ;;  %v4713_v57 = vld [vmem:[#allocation2 + $0x78] sm:$0xff] }
  0x1a   :  { %3970 = vmatpush3.bf16.msra.mxu0 %v4649_v25  ;;  %3874 = vmatpush3.bf16.msra.mxu1 %v4649_v25  ;;  %v115_v41 = vand.u32 4294901760, %v4660_v34  ;;  %v4678_v42 = vpack.c.bf16 %v97_v31, %v94_v26  ;;  %v4680_v43 = vpack.c.bf16 %v103_v33, %v100_v32  ;;  %v118_v44 = vand.u32 4294901760, %v4668_v38 }
  0x1b   :  { %3972 = vmatprep.subr.bf16.mxu0 %v4658_v30  ;;  %3876 = vmatprep.subr.bf16.mxu1 %v4658_v30  ;;  %v121_v45 = vand.u32 4294901760, %v4670_v39  ;;  %v4688_v47 = vsub.f32 %v59_v10, %v85_v13  ;;  %v4690_v48 = vpack.c.bf16 %v109_v37, %v106_v36  ;;  %v4694_v50 = vsub.f32 %v60_v14, %v88_v18 }
  0x1c   :  { %48 = vrot.lane.b32.xlu0 %v43_v24, %s4581_s0  ;;  %52 = vrot.lane.b32.xlu1 %v45_v35, %s4581_s0  ;;  %v4696_v51 = vsub.f32 %v61_v15, %v91_v19  ;;  %v4698_v52 = vsub.f32 %v62_v16, %v94_v26  ;;  %v4704_v53 = vpack.c.bf16 %v115_v41, %v112_v40  ;;  %v205_v54 = vand.u32 4294901760, %v4686_v46 }
  0x1d   :  { %v4707_v55 = vsub.f32 %v63_v20, %v97_v31  ;;  %v4709_v56 = vsub.f32 %v64_v21, %v100_v32  ;;  %v219_v58 = vand.u32 4294901760, %v4694_v50  ;;  %v4718_v61 = vsub.f32 %v65_v22, %v103_v33 }
  0x1e   :  { %3974 = vmatpush3.bf16.msra.mxu0 %v4658_v30  ;;  %3878 = vmatpush3.bf16.msra.mxu1 %v4658_v30  ;;  %v226_v59 = vand.u32 4294901760, %v4696_v51  ;;  %v233_v60 = vand.u32 4294901760, %v4698_v52  ;;  %v4724_v62 = vpack.c.bf16 %v121_v45, %v118_v44  ;;  %v124_v63 = vand.u32 4294901760, %v4692_v49 }
  0x1f   :  { %3976 = vmatprep.subr.bf16.mxu0 %v4678_v42  ;;  %3880 = vmatprep.subr.bf16.mxu1 %v4678_v42  ;;  %v212_v0 = vand.u32 4294901760, %v4688_v47  ;;  %v240_v5 = vand.u32 4294901760, %v4707_v55  ;;  %v220_v8 = vsub.f32 %v4694_v50, %v219_v58  ;;  %v127_v11 = vand.u32 4294901760, %v4713_v57 }
  0x20   :  { %v4729_v6 = vpack.c.bf16 %v226_v59, %v219_v58  ;;  %v227_v9 = vsub.f32 %v4696_v51, %v226_v59  ;;  %v234_v10 = vsub.f32 %v4698_v52, %v233_v60  ;;  %v4740_v12 = vsub.f32 %v4686_v46, %v205_v54 }
  0x21   :  { %v4742_v13 = vpack.c.bf16 %v240_v5, %v233_v60  ;;  %v241_v14 = vsub.f32 %v4707_v55, %v240_v5  ;;  %v221_v15 = vand.u32 4294901760, %v220_v8  ;;  %v247_v18 = vand.u32 4294901760, %v4709_v56 }
  0x22   :  { %3978 = vmatpush3.bf16.msra.mxu0 %v4678_v42  ;;  %3882 = vmatpush3.bf16.msra.mxu1 %v4678_v42  ;;  %v228_v16 = vand.u32 4294901760, %v227_v9  ;;  %v235_v17 = vand.u32 4294901760, %v234_v10  ;;  %v4751_v19 = vsub.f32 %v4688_v47, %v212_v0  ;;  %v254_v21 = vand.u32 4294901760, %v4718_v61 }
  0x23   :  { %3980 = vmatprep.subr.bf16.mxu0 %v4680_v43  ;;  %3884 = vmatprep.subr.bf16.mxu1 %v4680_v43  ;;  %v242_v20 = vand.u32 4294901760, %v241_v14  ;;  %v4755_v22 = vsub.f32 %v4651_v27, %v106_v36  ;;  %v248_v24 = vsub.f32 %v4709_v56, %v247_v18  ;;  %v4761_v26 = vsub.f32 %v4653_v28, %v109_v37 }
  0x24   :  { %v4757_v23 = vpack.c.bf16 %v228_v16, %v221_v15  ;;  %v4764_v31 = vsub.f32 %v4655_v29, %v112_v40  ;;  %v4770_v33 = vpack.c.bf16 %v254_v21, %v247_v18  ;;  %v255_v27 = vsub.f32 %v4718_v61, %v254_v21 }
  0x25   :  { %v4768_v32 = vpack.c.bf16 %v242_v20, %v235_v17  ;;  %v261_v35 = vand.u32 4294901760, %v4755_v22  ;;  %v249_v28 = vand.u32 4294901760, %v248_v24  ;;  %v268_v29 = vand.u32 4294901760, %v4761_v26 }
  0x26   :  { %3982 = vmatpush3.bf16.msra.mxu0 %v4680_v43  ;;  %3886 = vmatpush3.bf16.msra.mxu1 %v4680_v43  ;;  %v275_v36 = vand.u32 4294901760, %v4764_v31  ;;  %v281_v37 = vsub.f32 %v4660_v34, %v115_v41  ;;  %v256_v40 = vand.u32 4294901760, %v255_v27  ;;  %v288_v59 = vsub.f32 %v4668_v38, %v118_v44 }
  0x27   :  { %3984 = vmatprep.subr.bf16.mxu0 %v4690_v48  ;;  %3888 = vmatprep.subr.bf16.mxu1 %v4690_v48  ;;  %v262_v58 = vsub.f32 %v4755_v22, %v261_v35  ;;  %v295_v60 = vsub.f32 %v4670_v39, %v121_v45  ;;  %v4788_v5 = vpack.c.bf16 %v268_v29, %v261_v35  ;;  %vm961_vm5 = vcmp.lt.s32.totalorder %v4615_v1, 6 }
  0x28   :  { %v269_v8 = vsub.f32 %v4761_v26, %v268_v29  ;;  %v282_v9 = vand.u32 4294901760, %v281_v37  ;;  %v276_v10 = vsub.f32 %v4764_v31, %v275_v36  ;;  %v4794_v34 = vpack.c.bf16 %v256_v40, %v249_v28 }
  0x29   :  { %v263_v41 = vand.u32 4294901760, %v262_v58  ;;  %v289_v14 = vand.u32 4294901760, %v288_v59  ;;  %v296_v38 = vand.u32 4294901760, %v295_v60  ;;  %v302_v20 = vsub.f32 %v4692_v49, %v124_v63 }
  0x2a   :  { %3986 = vmatpush3.bf16.msra.mxu0 %v4690_v48  ;;  %3890 = vmatpush3.bf16.msra.mxu1 %v4690_v48  ;;  %v270_v39 = vand.u32 4294901760, %v269_v8  ;;  %v4798_v44 = vpack.c.bf16 %v282_v9, %v275_v36  ;;  %v277_v45 = vand.u32 4294901760, %v276_v10  ;;  %v283_v15 = vsub.f32 %v281_v37, %v282_v9 }
  0x2b   :  { %3988 = vmatprep.subr.bf16.mxu0 %v4704_v53  ;;  %3892 = vmatprep.subr.bf16.mxu1 %v4704_v53  ;;  %v4800_v16 = vpack.c.bf16 %v296_v38, %v289_v14  ;;  %v290_v17 = vsub.f32 %v288_v59, %v289_v14  ;;  %v297_v18 = vsub.f32 %v295_v60, %v296_v38  ;;  %v303_v36 = vand.u32 4294901760, %v302_v20 }
  0x2c   :  { %v4805_v21 = vpack.c.bf16 %v270_v39, %v263_v41  ;;  %v284_v24 = vand.u32 4294901760, %v283_v15  ;;  %v309_v27 = vsub.f32 %v4713_v57, %v127_v11  ;;  %v4812_v35 = vpack.c.bf16 %v127_v11, %v124_v63 }
  0x2d   :  { %v291_v28 = vand.u32 4294901760, %v290_v17  ;;  %v298_v29 = vand.u32 4294901760, %v297_v18  ;;  %v207_v40 = vand.u32 4294901760, %v4740_v12  ;;  %v214_v58 = vand.u32 4294901760, %v4751_v19 }
  0x2e   :  { %3990 = vmatpush3.bf16.msra.mxu0 %v4704_v53  ;;  %3894 = vmatpush3.bf16.msra.mxu1 %v4704_v53  ;;  %v4818_v57 = vpack.c.bf16 %v284_v24, %v277_v45  ;;  %v310_v8 = vand.u32 4294901760, %v309_v27  ;;  %v304_v10 = vsub.f32 %v302_v20, %v303_v36  ;;  %v3999_v12 = vpack.c.bf16 %v212_v0, %v205_v54 }
  0x2f   :  { %3992 = vmatprep.subr.bf16.mxu0 %v4724_v62  ;;  %3896 = vmatprep.subr.bf16.mxu1 %v4724_v62  ;;  %v4820_v9 = vpack.c.bf16 %v298_v29, %v291_v28  ;;  %v3903_v19 = vpack.c.bf16 %v214_v58, %v207_v40  ;;  %v4838_v38 = vpack.c.bf16 %v4688_v47, %v4686_v46  ;;  %vm1883_vm10 = vcmp.lt.s32.totalorder %v4615_v1, 4 }
  0x30   :  { %v4822_v49 = vpack.c.bf16 %v310_v8, %v303_v36  ;;  %v311_v63 = vsub.f32 %v309_v27, %v310_v8  ;;  %v305_v11 = vand.u32 4294901760, %v304_v10  ;;  %v4842_v39 = vpack.c.bf16 %v4696_v51, %v4694_v50 }
  0x31   :  { %v4846_v54 = vpack.c.bf16 %v4707_v55, %v4698_v52  ;;  %v4850_v0 = vpack.c.bf16 %v4718_v61, %v4709_v56  ;;  %v4854_v45 = vpack.c.bf16 %v4761_v26, %v4755_v22  ;;  %v4857_v15 = vpack.c.bf16 %v281_v37, %v4764_v31 }
  0x32   :  { %3994 = vmatpush3.bf16.msra.mxu0 %v4724_v62  ;;  %3898 = vmatpush3.bf16.msra.mxu1 %v4724_v62  ;;  %v312_v41 = vand.u32 4294901760, %v311_v63  ;;  %v4859_v46 = vpack.c.bf16 %v295_v60, %v288_v59  ;;  %v4861_v47 = vpack.c.bf16 %v309_v27, %v302_v20 }
  0x33   :  { %3996 = vmatprep.subr.bf16.mxu0 %v4812_v35  ;;  %3900 = vmatprep.subr.bf16.mxu1 %v4812_v35 }
  0x34   :  { %v4832_v14 = vpack.c.bf16 %v312_v41, %v305_v11  ;;  %v5042_v41 = vadd.s32 8, %v4615_v1 }
  0x36   :  { %3998 = vmatpush3.bf16.msra.mxu0 %v4812_v35  ;;  %3902 = vmatpush3.bf16.msra.mxu1 %v4812_v35 }
  0x37   :  { %4000 = vmatprep.subr.bf16.mxu0 %v3999_v12  ;;  %3904 = vmatprep.subr.bf16.mxu1 %v3903_v19 }
  0x8a   :  { %v47_v50 = vpop.permute.xlu0 %46  ;;  %v51_v52 = vpop.permute.xlu1 %50 }
  0x8b   :  { %v54_v51 = vadd.f32 %v47_v50, %v4620_v2  ;;  %v56_v55 = vadd.f32 %v51_v52, %v4631_v4 }
  0x8d   :  { %v4865_v17 = vand.u32 4294901760, %v54_v51  ;;  %v4867_v56 = vand.u32 4294901760, %v56_v55 }
  0x8e   :  { %v49_v61 = vpop.permute.xlu0 %48  ;;  %v53_v31 = vpop.permute.xlu1 %52 }
  0x8f   :  { %v4870_v22 = vsub.f32 %v54_v51, %v4865_v17  ;;  %v55_v26 = vadd.f32 %v49_v61, %v4625_v3  ;;  %v4874_v37 = vsub.f32 %v56_v55, %v4867_v56  ;;  %v57_v59 = vadd.f32 %v53_v31, %v4638_v7 }
  0x90   :  { %v5839_v55 = vmov 0.0  }
  0x91   :  { %v4877_v2 = vand.u32 4294901760, %v55_v26  ;;  %v164_v4 = vand.u32 4294901760, %v4870_v22  ;;  %v4880_v60 = vand.u32 4294901760, %v57_v59  ;;  %v184_v18 = vand.u32 4294901760, %v4874_v37 }
  0x93   :  { %v4884_v20 = vsub.f32 %v55_v26, %v4877_v2  ;;  %3333 = vmatprep.mubr.f32.mxu0 %v164_v4  ;;  %v165_v3 = vsub.f32 %v4870_v22, %v164_v4  ;;  %v4888_v24 = vsub.f32 %v57_v59, %v4880_v60  ;;  %v185_v28 = vsub.f32 %v4874_v37, %v184_v18 }
  0x95   :  { %v166_v27 = vand.u32 4294901760, %v165_v3  ;;  %v174_v7 = vand.u32 4294901760, %v4884_v20  ;;  %v194_v29 = vand.u32 4294901760, %v4888_v24  ;;  %v186_v8 = vand.u32 4294901760, %v185_v28 }
  0x97   :  { %3219 = vmatprep.mubr.f32.mxu1 %v166_v27  ;;  %3334 = vmatmul.mubr.f32.vlgmr.msra.gmra.mrb[0].mxu0 %v174_v7  ;;  %v175_v36 = vsub.f32 %v4884_v20, %v174_v7  ;;  %v195_v40 = vsub.f32 %v4888_v24, %v194_v29 }
  0x98   :  { %4002 = vmatpush3.bf16.msra.mxu0 %v3999_v12  ;;  %3336 = vmatprep.mubr.f32.mxu0 %v184_v18 }
  0x99   :  { %4004 = vmatprep.subr.bf16.mxu0 %v4729_v6  ;;  %v176_v58 = vand.u32 4294901760, %v175_v36  ;;  %v196_v10 = vand.u32 4294901760, %v195_v40 }
  0x9b   :  { %3220 = vmatmul.mubr.f32.vlgmr.msra.gmra.mrb[0].mxu1 %v176_v58  ;;  %3337 = vmatmul.mubr.f32.gmra.mrb[2].mxu0 %v194_v29 }
  0x9c   :  { %3906 = vmatpush3.bf16.msra.mxu1 %v3903_v19  ;;  %4006 = vmatpush3.bf16.msra.mxu0 %v4729_v6  ;;  %v4982_v6 = vld [vmem:[#allocation2 + $0xa0] sm:$0xff] }
  0x9d   :  { %3371 = vmatprep.mubr.f32.mxu0 %v4865_v17  ;;  %3222 = vmatprep.mubr.f32.mxu1 %v186_v8 }
  0x9e   :  { %3908 = vmatprep.subr.bf16.mxu1 %v4757_v23  ;;  %4008 = vmatprep.subr.bf16.mxu0 %v4742_v13 }
  0x9f   :  { %3223 = vmatmul.mubr.f32.gmra.mrb[2].mxu1 %v196_v10 }
  0xa0   :  { %3910 = vmatpush3.bf16.msra.mxu1 %v4757_v23  ;;  %4010 = vmatpush3.bf16.msra.mxu0 %v4742_v13  ;;  %v4984_v13 = vld [vmem:[#allocation2 + $0xa8] sm:$0xff] }
  0xa1   :  { %3257 = vmatprep.mubr.f32.mxu1 %v4865_v17  ;;  %3912 = vmatprep.subr.bf16.mxu1 %v4768_v32 }
  0xa2   :  { %4012 = vmatprep.subr.bf16.mxu0 %v4770_v33 }
  0xa4   :  { %3914 = vmatpush3.bf16.msra.mxu1 %v4768_v32  ;;  %4014 = vmatpush3.bf16.msra.mxu0 %v4770_v33  ;;  %v1016_v33 = vand.u32 4294901760, %v4982_v6 }
  0xa5   :  { %3916 = vmatprep.subr.bf16.mxu1 %v4794_v34  ;;  %4016 = vmatprep.subr.bf16.mxu0 %v4788_v5 }
  0xa8   :  { %3918 = vmatpush3.bf16.msra.mxu1 %v4794_v34  ;;  %4018 = vmatpush3.bf16.msra.mxu0 %v4788_v5  ;;  %v1019_v5 = vand.u32 4294901760, %v4984_v13 }
  0xa9   :  { %3920 = vmatprep.subr.bf16.mxu1 %v4805_v21  ;;  %4020 = vmatprep.subr.bf16.mxu0 %v4798_v44 }
  0xac   :  { %3922 = vmatpush3.bf16.msra.mxu1 %v4805_v21  ;;  %4022 = vmatpush3.bf16.msra.mxu0 %v4798_v44  ;;  %v5001_v44 = vld [vmem:[#allocation2 + $0xb0] sm:$0xff]  ;;  %v5012_v21 = vpack.c.bf16 %v1019_v5, %v1016_v33 }
  0xad   :  { %3924 = vmatprep.subr.bf16.mxu1 %v4818_v57  ;;  %4024 = vmatprep.subr.bf16.mxu0 %v4800_v16 }
  0xb0   :  { %3926 = vmatpush3.bf16.msra.mxu1 %v4818_v57  ;;  %4026 = vmatpush3.bf16.msra.mxu0 %v4800_v16  ;;  %v5003_v16 = vld [vmem:[#allocation2 + $0xb8] sm:$0xff] }
  0xb1   :  { %3928 = vmatprep.subr.bf16.mxu1 %v4820_v9  ;;  %4028 = vmatprep.subr.bf16.mxu0 %v4822_v49  ;;  %v1025_v57 = vand.u32 4294901760, %v5003_v16 }
  0xb4   :  { %3930 = vmatpush3.bf16.msra.mxu1 %v4820_v9  ;;  %4030 = vmatpush3.bf16.msra.mxu0 %v4822_v49  ;;  %v5016_v9 = vld [vmem:[#allocation2 + $0xc0] sm:$0xff]  ;;  %v5018_v49 = vld [vmem:[#allocation2 + $0xc8] sm:$0xff] }
  0xb5   :  { %3932 = vmatprep.subr.bf16.mxu1 %v4832_v14  ;;  %4032 = vmatprep.subr.bf16.mxu0 %v4649_v25  ;;  %v1028_v11 = vand.u32 4294901760, %v5016_v9  ;;  %v1031_v12 = vand.u32 4294901760, %v5018_v49 }
  0xb7   :  { %3372 = vmatmul.mubr.f32.vlgmr.msra.gmra.mrb[0].mxu0 %v4877_v2  ;;  %v5036_v19 = vpack.c.bf16 %v1031_v12, %v1028_v11 }
  0xb8   :  { %3934 = vmatpush3.bf16.msra.mxu1 %v4832_v14  ;;  %3374 = vmatprep.mubr.f32.mxu0 %v4867_v56  ;;  %v862_v14 = vand.u32 1, %v5042_v41 }
  0xb9   :  { %4034 = vmatpush3.bf16.msra.mxu0 %v4649_v25  ;;  %3936 = vmatprep.subr.bf16.mxu1 %v4838_v38  ;;  %v4971_v25 = vld [vmem:[#allocation2 + $0x80] sm:$0xff] }
  0xba   :  { %4036 = vmatprep.subr.bf16.mxu0 %v4658_v30  ;;  %vm900_vm1 = vcmp.eq.s32.totalorder %v862_v14, 0 }
  0xbb   :  { %3258 = vmatmul.mubr.f32.vlgmr.msra.gmra.mrb[0].mxu1 %v4877_v2  ;;  %3375 = vmatmul.mubr.f32.gmra.mrb[2].mxu0 %v4880_v60 }
  0xbc   :  { %3260 = vmatprep.mubr.f32.mxu1 %v4867_v56  ;;  %3938 = vmatpush3.bf16.msra.mxu1 %v4838_v38  ;;  %v855_v38 = vand.u32 1, %v4615_v1 }
  0xbd   :  { %4038 = vmatpush3.bf16.msra.mxu0 %v4658_v30  ;;  %3409 = vmatprep.mubr.f32.mxu0 %v4865_v17  ;;  %v4973_v30 = vld [vmem:[#allocation2 + $0x88] sm:$0xff]  ;;  %v2812_v17 = vsel %vm900_vm1, 1.0, %v5839_v55 }
  0xbe   :  { %3940 = vmatprep.subr.bf16.mxu1 %v4842_v39  ;;  %4040 = vmatprep.subr.bf16.mxu0 %v4678_v42  ;;  %vm899_vm2 = vcmp.eq.s32.totalorder %v855_v38, 0 }
  0xbf   :  { %3261 = vmatmul.mubr.f32.gmra.mrb[2].mxu1 %v4880_v60  ;;  %v2811_v31 = vsel %vm899_vm2, 1.0, %v5839_v55 }
  0xc0   :  { %3942 = vmatpush3.bf16.msra.mxu1 %v4842_v39  ;;  %3295 = vmatprep.mubr.f32.mxu1 %v4870_v22  ;;  %v5047_v39 = vadd.s32 16, %v4615_v1 }
  0xc1   :  { %4042 = vmatpush3.bf16.msra.mxu0 %v4678_v42  ;;  %3944 = vmatprep.subr.bf16.mxu1 %v4846_v54  ;;  %v4975_v42 = vld [vmem:[#allocation2 + $0x90] sm:$0xff] }
  0xc2   :  { %4044 = vmatprep.subr.bf16.mxu0 %v4680_v43 }
  0xc4   :  { %3946 = vmatpush3.bf16.msra.mxu1 %v4846_v54 }
  0xc5   :  { %4046 = vmatpush3.bf16.msra.mxu0 %v4680_v43  ;;  %3948 = vmatprep.subr.bf16.mxu1 %v4850_v0  ;;  %v1004_v43 = vand.u32 4294901760, %v4971_v25 }
  0xc6   :  { %4048 = vmatprep.subr.bf16.mxu0 %v4690_v48 }
  0xc8   :  { %3950 = vmatpush3.bf16.msra.mxu1 %v4850_v0 }
  0xc9   :  { %4050 = vmatpush3.bf16.msra.mxu0 %v4690_v48  ;;  %3952 = vmatprep.subr.bf16.mxu1 %v4854_v45  ;;  %v1007_v48 = vand.u32 4294901760, %v4973_v30 }
  0xca   :  { %4052 = vmatprep.subr.bf16.mxu0 %v4704_v53 }
  0xcb   :  { %v4991_v32 = vpack.c.bf16 %v1007_v48, %v1004_v43 }
  0xcc   :  { %3954 = vmatpush3.bf16.msra.mxu1 %v4854_v45  ;;  %v2810_v45 = vld [vmem:[%s5837_s2] ss:$0 sm:$0xff] }
  0xcd   :  { %4054 = vmatpush3.bf16.msra.mxu0 %v4704_v53  ;;  %3956 = vmatprep.subr.bf16.mxu1 %v4857_v15  ;;  %v4979_v53 = vld [vmem:[#allocation2 + $0x98] sm:$0xff] }
  0xce   :  { %4056 = vmatprep.subr.bf16.mxu0 %v4724_v62  ;;  %v1013_v23 = vand.u32 4294901760, %v4979_v53 }
  0xd0   :  { %3958 = vmatpush3.bf16.msra.mxu1 %v4857_v15  ;;  %v5053_v15 = vadd.s32 24, %v4615_v1 }
  0xd1   :  { %4058 = vmatpush3.bf16.msra.mxu0 %v4724_v62  ;;  %3960 = vmatprep.subr.bf16.mxu1 %v4859_v46  ;;  %v1010_v62 = vand.u32 4294901760, %v4975_v42 }
  0xd2   :  { %4060 = vmatprep.subr.bf16.mxu0 %v4812_v35  ;;  %v876_v22 = vand.u32 1, %v5053_v15 }
  0xd3   :  { %v4999_v34 = vpack.c.bf16 %v1013_v23, %v1010_v62 }
  0xd4   :  { %3962 = vmatpush3.bf16.msra.mxu1 %v4859_v46  ;;  %vm902_vm4 = vcmp.eq.s32.totalorder %v876_v22, 0 }
  0xd5   :  { %4062 = vmatpush3.bf16.msra.mxu0 %v4812_v35  ;;  %3964 = vmatprep.subr.bf16.mxu1 %v4861_v47  ;;  %v1022_v35 = vand.u32 4294901760, %v5001_v44  ;;  %v2814_v28 = vsel %vm902_vm4, 1.0, %v5839_v55 }
  0xd7   :  { %v5026_v63 = vpack.c.bf16 %v1025_v57, %v1022_v35 }
  0xd8   :  { %3410 = vmatmul.mubr.f32.vlgmr.msra.gmra.mrb[0].mxu0 %v4877_v2  ;;  %3966 = vmatpush3.bf16.msra.mxu1 %v4861_v47  ;;  %v869_v47 = vand.u32 1, %v5047_v39 }
  0xd9   :  { %3412 = vmatprep.mubr.f32.mxu0 %v4867_v56  ;;  %4064 = vmatprep.subr.bf16.mxu1 %v4991_v32 }
  0xda   :  { %vm901_vm3 = vcmp.eq.s32.totalorder %v869_v47, 0 }
  0xdb   :  { %3296 = vmatmul.mubr.f32.vlgmr.msra.gmra.mrb[0].mxu1 %v4884_v20 }
  0xdc   :  { %3413 = vmatmul.mubr.f32.gmra.mrb[2].mxu0 %v4880_v60  ;;  %3298 = vmatprep.mubr.f32.mxu1 %v4874_v37 }
  0xdd   :  { %4066 = vmatpush3.bf16.msra.mxu1 %v4991_v32 }
  0xde   :  { %4068 = vmatprep.subr.bf16.mxu1 %v4999_v34 }
  0xdf   :  { %3299 = vmatmul.mubr.f32.gmra.mrb[2].mxu1 %v4888_v24  ;;  %v2813_v24 = vsel %vm901_vm3, 1.0, %v5839_v55 }
  0xe1   :  { %4070 = vmatpush3.bf16.msra.mxu1 %v4999_v34 }
  0xe2   :  { %4072 = vmatprep.subr.bf16.mxu1 %v5012_v21 }
  0xe5   :  { %4074 = vmatpush3.bf16.msra.mxu1 %v5012_v21 }
  0xe6   :  { %4076 = vmatprep.subr.bf16.mxu1 %v5026_v63 }
  0xe9   :  { %4078 = vmatpush3.bf16.msra.mxu1 %v5026_v63 }
  0xea   :  { %4080 = vmatprep.subr.bf16.mxu1 %v5036_v19 }
  0xed   :  { %4082 = vmatpush3.bf16.msra.mxu1 %v5036_v19 }
 0x1ab   :  { %v3411_v54 = vpop.f32.mrb[0].mxu0 }
 0x1ac   :  { %v829_v0 = vpop.f32.mrb[1].mxu0 }
 0x1ae   :  { %v3297_v46 = vpop.f32.mrb[0].mxu1 }
 0x1af   :  { %v4447_v50 = vadd.f32 %v3297_v46, %v2810_v45  ;;  %v3414_v51 = vpop.f32.mrb[2].mxu0  ;;  %v471_v52 = vpop.f32.mrb[1].mxu1 }
 0x1b0   :  { %v4449_v56 = vadd.f32 %v2810_v45, %v471_v52  ;;  %v841_v61 = vpop.f32.mrb[3].mxu0 }
 0x1b1   :  { %v4448_v26 = vadd.f32 %v4447_v50, %v3411_v54 }
 0x1b2   :  { %v4450_v37 = vadd.f32 %v4449_v56, %v829_v0  ;;  %v3300_v59 = vpop.f32.mrb[2].mxu1 }
 0x1b3   :  { %v912_v2 = vmul.f32 %v4448_v26, %v2812_v17  ;;  %v4451_v4 = vadd.f32 %v3300_v59, %v2810_v45  ;;  %v485_v60 = vpop.f32.mrb[3].mxu1 }
 0x1b4   :  { %v911_v18 = vmul.f32 %v4450_v37, %v2811_v31  ;;  %v4453_v20 = vadd.f32 %v2810_v45, %v485_v60 }
 0x1b5   :  { %v4452_v3 = vadd.f32 %v4451_v4, %v3414_v51 }
 0x1b6   :  { %v915_v27 = vadd.f32 %v912_v2, %v911_v18  ;;  %v4454_v7 = vadd.f32 %v4453_v20, %v841_v61 }
 0x1b7   :  { %v914_v36 = vmul.f32 %v4452_v3, %v2814_v28 }
 0x1b8   :  { %v913_v29 = vmul.f32 %v4454_v7, %v2813_v24 }
 0x1ba   :  { %v916_v40 = vadd.f32 %v915_v27, %v913_v29 }
 0x1bc   :  { %v917_v58 = vadd.f32 %v916_v40, %v914_v36 }
 0x1be   :  { %v918_v8 = vrot.slane %v917_v58, 4 }
 0x1c0   :  { %v919_v10 = vadd.f32 %v918_v8, %v917_v58 }
 0x1c2   :  { %v920_v14 = vrot.slane %v919_v10, 2 }
 0x1c4   :  { %v921_v38 = vadd.f32 %v920_v14, %v919_v10 }
 0x1c6   :  { %v922_v54 = vrot.slane %v921_v38, 1 }
 0x1c8   :  { %v923_v0 = vadd.f32 %v922_v54, %v921_v38 }
 0x1ca   :  { %v924_v46 = vmul.f32 0.0625, %v923_v0 }
 0x1cc   :  { %v925_v47 = vsub.f32 %v4450_v37, %v924_v46  ;;  %v926_v45 = vsub.f32 %v4448_v26, %v924_v46  ;;  %v927_v50 = vsub.f32 %v4454_v7, %v924_v46  ;;  %v928_v51 = vsub.f32 %v4452_v3, %v924_v46  ;;  %v991_v46 = vld [vmem:[#allocation2 + $0xe0] sm:$0xff] }
 0x1ce   :  { %v929_v52 = vmul.f32 %v925_v47, %v925_v47  ;;  %v930_v56 = vmul.f32 %v926_v45, %v926_v45  ;;  %v931_v61 = vmul.f32 %v927_v50, %v927_v50  ;;  %v932_v22 = vmul.f32 %v928_v51, %v928_v51 }
 0x1d0   :  { %v933_v59 = vmul.f32 %v2811_v31, %v929_v52  ;;  %v934_v2 = vmul.f32 %v2812_v17, %v930_v56  ;;  %v935_v4 = vmul.f32 %v2813_v24, %v931_v61  ;;  %v936_v18 = vmul.f32 %v2814_v28, %v932_v22  ;;  %v989_v17 = vld [vmem:[#allocation2 + $0xd0] sm:$0xff]  ;;  %v990_v24 = vld [vmem:[#allocation2 + $0xd8] sm:$0xff]  ;;  %v992_v52 = vld [vmem:[#allocation2 + $0xe8] sm:$0xff] }
 0x1d1   :  { %v1034_v28 = vand.u32 4294901760, %v989_v17  ;;  %v1037_v54 = vand.u32 4294901760, %v990_v24  ;;  %v1040_v56 = vand.u32 4294901760, %v991_v46  ;;  %v1043_v61 = vand.u32 4294901760, %v992_v52  ;;  %v994_v22 = vld [vmem:[#allocation2 + $0xf8] sm:$0xff] }
 0x1d2   :  { %v937_v60 = vadd.f32 %v934_v2, %v933_v59  ;;  %v1049_v2 = vand.u32 4294901760, %v994_v22 }
 0x1d3   :  { %v5061_v0 = vpack.c.bf16 %v1037_v54, %v1034_v28 }
 0x1d4   :  { %v938_v20 = vadd.f32 %v937_v60, %v935_v4 }
 0x1d5   :  { %4084 = vmatprep.subr.bf16.mxu1 %v5061_v0 }
 0x1d6   :  { %v939_v27 = vadd.f32 %v938_v20, %v936_v18  ;;  %4086 = vmatpush3.bf16.msra.mxu1 %v5061_v0 }
 0x1d8   :  { %v940_v29 = vrot.slane %v939_v27, 4 }
 0x1da   :  { %v941_v36 = vadd.f32 %v940_v29, %v939_v27 }
 0x1dc   :  { %v942_v40 = vrot.slane %v941_v36, 2 }
 0x1de   :  { %v943_v58 = vadd.f32 %v942_v40, %v941_v36 }
 0x1e0   :  { %v944_v8 = vrot.slane %v943_v58, 1 }
 0x1e2   :  { %v945_v37 = vadd.f32 %v944_v8, %v943_v58 }
 0x1e4   :  { %v946_v26 = vmul.f32 0.0625, %v945_v37 }
 0x1e6   :  { %v947_v7 = vadd.f32 1e-05, %v946_v26 }
 0x1e8   :  { %4524 = vrsqrt.f32 %v947_v7 }
 0x1f2   :  { %v4525_v3 = vpop.eup %4524 }
 0x1f3   :  { %v951_v10 = vmul.f32 %v4525_v3, %v927_v50  ;;  %v950_v14 = vmul.f32 %v4525_v3, %v926_v45  ;;  %v949_v38 = vmul.f32 %v4525_v3, %v925_v47  ;;  %v952_v31 = vmul.f32 %v4525_v3, %v928_v51  ;;  %v993_v51 = vld [vmem:[#allocation2 + $0xf0] sm:$0xff] }
 0x1f4   :  { %v5065_v47 = vpack.c.bf16 %v1043_v61, %v1040_v56  ;;  %v5070_v45 = vsub.f32 %v4971_v25, %v1004_v43  ;;  %v5075_v50 = vsub.f32 %v4973_v30, %v1007_v48  ;;  %v1046_v59 = vand.u32 4294901760, %v993_v51 }
 0x1f5   :  { %4526 = vtanh.f32 %v951_v10 }
 0x1f6   :  { %4528 = vtanh.f32 %v950_v14  ;;  %4088 = vmatprep.subr.bf16.mxu1 %v5065_v47  ;;  %v1127_v4 = vand.u32 4294901760, %v5070_v45  ;;  %v5852_v60 = vand.u32 4294901760, %v5075_v50  ;;  %v5083_v25 = vpack.c.bf16 %v1049_v2, %v1046_v59 }
 0x1f7   :  { %4530 = vtanh.f32 %v949_v38  ;;  %4090 = vmatpush3.bf16.msra.mxu1 %v5065_v47  ;;  %v5113_v38 = vsub.f32 %v989_v17, %v1034_v28 }
 0x1f8   :  { %4532 = vtanh.f32 %v952_v31  ;;  %v1128_v30 = vsub.f32 %v5070_v45, %v1127_v4  ;;  %v1135_v43 = vsub.f32 %v5075_v50, %v5852_v60  ;;  %4092 = vmatprep.subr.bf16.mxu1 %v5083_v25  ;;  %v5115_v31 = vsub.f32 %v990_v24, %v1037_v54 }
 0x1fa   :  { %v1129_v36 = vand.u32 4294901760, %v1128_v30  ;;  %v1136_v40 = vand.u32 4294901760, %v1135_v43  ;;  %v5846_v30 = vand.u32 4294901760, %v5113_v38  ;;  %v5845_v43 = vand.u32 4294901760, %v5115_v31 }
 0x1fb   :  { %4094 = vmatpush3.bf16.msra.mxu1 %v5083_v25 }
 0x1fc   :  { %v5100_v7 = vpack.c.bf16 %v1136_v40, %v1129_v36  ;;  %v5122_v36 = vsub.f32 %v991_v46, %v1040_v56  ;;  %v5124_v40 = vsub.f32 %v992_v52, %v1043_v61  ;;  %v5137_v52 = vsub.f32 %v993_v51, %v1046_v59 }
 0x1fd   :  { %v5139_v56 = vsub.f32 %v994_v22, %v1049_v2 }
 0x1fe   :  { %4096 = vmatprep.subr.bf16.mxu1 %v5100_v7  ;;  %v5844_v24 = vand.u32 4294901760, %v5122_v36  ;;  %v5843_v28 = vand.u32 4294901760, %v5124_v40 }
 0x1ff   :  { %v5081_v18 = vpop.eup %4526 }
 0x200   :  { %v4529_v48 = vpop.eup %4528  ;;  %v959_v20 = vrot.slane %v5081_v18, 2  ;;  %v1219_v46 = vsub.f32 %v5124_v40, %v5843_v28 }
 0x201   :  { %v4531_v27 = vpop.eup %4530  ;;  %v958_v29 = vrot.slane %v4529_v48, 2 }
 0x202   :  { %v5094_v58 = vpop.eup %4532  ;;  %v957_v8 = vrot.slane %v4531_v27, 2 }
 0x203   :  { %v963_v37 = vsel %vm961_vm5, %v958_v29, %v959_v20  ;;  %v960_v26 = vrot.slane %v5094_v58, 2 }
 0x204   :  { %968 = vrot.lane.b32.xlu1 %v963_v37, %s4581_s0  ;;  %v964_v3 = vsel %vm961_vm5, %v957_v8, %v958_v29  ;;  %v1198_v29 = vsub.f32 %v5113_v38, %v5846_v30 }
 0x205   :  { %966 = vrot.lane.b32.xlu0 %v964_v3, %s4581_s0  ;;  %v965_v10 = vsel %vm961_vm5, %v960_v26, %v957_v8  ;;  %v962_v14 = vsel %vm961_vm5, %v959_v20, %v960_v26  ;;  %v1205_v20 = vsub.f32 %v5115_v31, %v5845_v43  ;;  %v1212_v8 = vsub.f32 %v5122_v36, %v5844_v24 }
 0x206   :  { %v1199_v17 = vand.u32 4294901760, %v1198_v29  ;;  %v1220_v26 = vand.u32 4294901760, %v1219_v46  ;;  %v5842_v3 = vand.u32 4294901760, %v5137_v52  ;;  %v5174_v46 = vsub.f32 %v4975_v42, %v1010_v62 }
 0x207   :  { %v1206_v54 = vand.u32 4294901760, %v1205_v20  ;;  %v1213_v37 = vand.u32 4294901760, %v1212_v8  ;;  %v5157_v20 = vpack.c.bf16 %v5075_v50, %v5070_v45  ;;  %v5169_v8 = vpack.c.bf16 %v5139_v56, %v5137_v52 }
 0x208   :  { %972 = vrot.lane.b32.xlu1 %v965_v10, %s4581_s0  ;;  %v5841_v10 = vand.u32 4294901760, %v5139_v56  ;;  %v1226_v29 = vsub.f32 %v5137_v52, %v5842_v3 }
 0x209   :  { %970 = vrot.lane.b32.xlu0 %v962_v14, %s4581_s0  ;;  %v5141_v61 = vpack.c.bf16 %v1206_v54, %v1199_v17  ;;  %v5145_v14 = vpack.c.bf16 %v1220_v26, %v1213_v37  ;;  %v5161_v17 = vpack.c.bf16 %v5115_v31, %v5113_v38  ;;  %v5165_v54 = vpack.c.bf16 %v5124_v40, %v5122_v36 }
 0x20a   :  { %v1233_v51 = vsub.f32 %v5139_v56, %v5841_v10  ;;  %v1227_v22 = vand.u32 4294901760, %v1226_v29  ;;  %v5179_v37 = vsub.f32 %v4979_v53, %v1013_v23  ;;  %v5851_v26 = vand.u32 4294901760, %v5174_v46 }
 0x20c   :  { %v1234_v59 = vand.u32 4294901760, %v1233_v51  ;;  %v5850_v29 = vand.u32 4294901760, %v5179_v37  ;;  %v5186_v51 = vsub.f32 %v4982_v6, %v1016_v33  ;;  %v1142_v53 = vsub.f32 %v5174_v46, %v5851_v26 }
 0x20e   :  { %v5153_v2 = vpack.c.bf16 %v1234_v59, %v1227_v22  ;;  %v5191_v22 = vsub.f32 %v4984_v13, %v1019_v5  ;;  %v1149_v23 = vsub.f32 %v5179_v37, %v5850_v29  ;;  %v5848_v6 = vand.u32 4294901760, %v5186_v51 }
 0x20f   :  { %v1143_v43 = vand.u32 4294901760, %v1142_v53  ;;  %v5875_v45 = vand.u32 4294901760, %v5186_v51 }
 0x210   :  { %v5847_v33 = vand.u32 4294901760, %v5191_v22  ;;  %v1150_v30 = vand.u32 4294901760, %v1149_v23  ;;  %v5246_v23 = vsub.f32 %v5016_v9, %v1028_v11 }
 0x276   :  { %v969_v42 = vpop.permute.xlu1 %968 }
 0x277   :  { %v975_v62 = vadd.f32 %v4529_v48, %v969_v42  ;;  %v967_v59 = vpop.permute.xlu0 %966  ;;  %v5208_v48 = vsub.f32 %v5001_v44, %v1022_v35 }
 0x278   :  { %v974_v55 = vadd.f32 %v4531_v27, %v967_v59  ;;  %v5213_v27 = vsub.f32 %v5003_v16, %v1025_v57  ;;  %v1156_v16 = vsub.f32 %v5186_v51, %v5848_v6  ;;  %v1163_v57 = vsub.f32 %v5191_v22, %v5847_v33 }
 0x279   :  { %v5199_v10 = vand.u32 4294901760, %v975_v62 }
 0x27a   :  { %v5203_v13 = vand.u32 4294901760, %v974_v55  ;;  %v973_v5 = vpop.permute.xlu1 %972  ;;  %v1157_v26 = vand.u32 4294901760, %v1156_v16  ;;  %v1164_v11 = vand.u32 4294901760, %v1163_v57 }
 0x27b   :  { %v5216_v42 = vsub.f32 %v975_v62, %v5199_v10  ;;  %v977_v59 = vadd.f32 %v5094_v58, %v973_v5  ;;  %v971_v3 = vpop.permute.xlu0 %970  ;;  %v5251_v5 = vsub.f32 %v5018_v49, %v1031_v12 }
 0x27c   :  { %v5220_v28 = vsub.f32 %v974_v55, %v5203_v13  ;;  %v976_v24 = vadd.f32 %v5081_v18, %v971_v3  ;;  %v5853_v18 = vand.u32 4294901760, %v5208_v48  ;;  %v5855_v3 = vand.u32 4294901760, %v5213_v27 }
 0x27d   :  { %v5849_v44 = vand.u32 4294901760, %v5216_v42  ;;  %v5224_v35 = vand.u32 4294901760, %v977_v59 }
 0x27e   :  { %v5232_v58 = vand.u32 4294901760, %v976_v24  ;;  %v1086_v55 = vand.u32 4294901760, %v5220_v28  ;;  %v1170_v49 = vsub.f32 %v5208_v48, %v5853_v18 }
 0x27f   :  { %v1097_v62 = vsub.f32 %v5216_v42, %v5849_v44  ;;  %v5241_v53 = vsub.f32 %v977_v59, %v5224_v35  ;;  %v4099_v59 = vpack.c.bf16 %v1150_v30, %v1143_v43  ;;  %v1183_v30 = vand.u32 4294901760, %v5246_v23 }
 0x280   :  { %v5254_v33 = vsub.f32 %v976_v24, %v5232_v58  ;;  %v1087_v6 = vsub.f32 %v5220_v28, %v1086_v55  ;;  %v1177_v24 = vsub.f32 %v5213_v27, %v5855_v3  ;;  %v1190_v43 = vand.u32 4294901760, %v5251_v5 }
 0x281   :  { %v1098_v44 = vand.u32 4294901760, %v1097_v62  ;;  %v5854_v29 = vand.u32 4294901760, %v5241_v53  ;;  %v4103_v62 = vpack.c.bf16 %v1164_v11, %v1157_v26  ;;  %v1171_v18 = vand.u32 4294901760, %v1170_v49  ;;  %v5437_v49 = vld [vmem:[#allocation2 + $0x140] sm:$0xff] }
 0x282   :  { %v1088_v60 = vand.u32 4294901760, %v1087_v6  ;;  %v1106_v9 = vand.u32 4294901760, %v5254_v33  ;;  %v1184_v3 = vsub.f32 %v5246_v23, %v1183_v30 }
 0x283   :  { %v1117_v12 = vsub.f32 %v5241_v53, %v5854_v29  ;;  %v1178_v29 = vand.u32 4294901760, %v1177_v24 }
 0x284   :  { %3447 = vmatprep.mubr.f32.mxu1 %v1088_v60  ;;  %v1107_v6 = vsub.f32 %v5254_v33, %v1106_v9  ;;  %v1191_v60 = vsub.f32 %v5251_v5, %v1190_v43 }
 0x285   :  { %3448 = vmatmul.mubr.f32.vlgmr.msra.gmra.mrb[4].mxu1 %v1098_v44  ;;  %v1118_v16 = vand.u32 4294901760, %v1117_v12  ;;  %v1185_v44 = vand.u32 4294901760, %v1184_v3  ;;  %v5439_v12 = vld [vmem:[#allocation2 + $0x148] sm:$0xff] }
 0x286   :  { %4098 = vmatpush3.bf16.msra.mxu1 %v5100_v7  ;;  %v1108_v57 = vand.u32 4294901760, %v1107_v6  ;;  %v4107_v7 = vpack.c.bf16 %v1178_v29, %v1171_v18  ;;  %v1192_v26 = vand.u32 4294901760, %v1191_v60  ;;  %v4131_v29 = vpack.c.bf16 %v5179_v37, %v5174_v46 }
 0x287   :  { %4100 = vmatprep.subr.bf16.mxu1 %v4099_v59  ;;  %v5877_v18 = vand.u32 4294901760, %v5241_v53  ;;  %v1791_v60 = vand.u32 3, %v5047_v39 }
 0x288   :  { %3450 = vmatprep.mubr.f32.mxu1 %v1108_v57  ;;  %v4111_v11 = vpack.c.bf16 %v1192_v26, %v1185_v44  ;;  %v1777_v57 = vand.u32 3, %v4615_v1  ;;  %v5886_v44 = vmov 0.0  }
 0x289   :  { %3451 = vmatmul.mubr.f32.gmra.mrb[6].mxu1 %v1118_v16  ;;  %v1784_v16 = vand.u32 3, %v5042_v41  ;;  %vm1823_vm8 = vcmp.eq.s32.totalorder %v1791_v60, 0 }
 0x28a   :  { %4102 = vmatpush3.bf16.msra.mxu1 %v4099_v59  ;;  %3485 = vmatprep.mubr.f32.mxu1 %v5203_v13  ;;  %vm1821_vm7 = vcmp.eq.s32.totalorder %v1777_v57, 0 }
 0x28b   :  { %4104 = vmatprep.subr.bf16.mxu1 %v4103_v62  ;;  %vm1822_vm6 = vcmp.eq.s32.totalorder %v1784_v16, 0 }
 0x28c   :  { %v2818_v26 = vsel %vm1822_vm6, 1.0, %v5886_v44 }
 0x28e   :  { %4106 = vmatpush3.bf16.msra.mxu1 %v4103_v62  ;;  %v2816_v62 = vld [vmem:[%s5837_s2 + $0x1] ss:$0 sm:$0xff] }
 0x28f   :  { %4108 = vmatprep.subr.bf16.mxu1 %v4107_v7 }
 0x292   :  { %4110 = vmatpush3.bf16.msra.mxu1 %v4107_v7 }
 0x293   :  { %4112 = vmatprep.subr.bf16.mxu1 %v4111_v11 }
 0x296   :  { %4114 = vmatpush3.bf16.msra.mxu1 %v4111_v11  ;;  %v1798_v11 = vand.u32 3, %v5053_v15 }
 0x297   :  { %4116 = vmatprep.subr.bf16.mxu1 %v5141_v61 }
 0x298   :  { %vm1824_vm9 = vcmp.eq.s32.totalorder %v1798_v11, 0 }
 0x29a   :  { %4118 = vmatpush3.bf16.msra.mxu1 %v5141_v61  ;;  %v4135_v61 = vpack.c.bf16 %v5191_v22, %v5186_v51  ;;  %v4207_v51 = vpack.c.bf16 %v1190_v43, %v1183_v30  ;;  %v1950_v30 = vand.u32 4294901760, %v5437_v49  ;;  %v1953_v43 = vand.u32 4294901760, %v5439_v12 }
 0x29b   :  { %4120 = vmatprep.subr.bf16.mxu1 %v5145_v14 }
 0x29c   :  { %v5457_v6 = vpack.c.bf16 %v1953_v43, %v1950_v30 }
 0x29e   :  { %4122 = vmatpush3.bf16.msra.mxu1 %v5145_v14  ;;  %v4139_v14 = vpack.c.bf16 %v5213_v27, %v5208_v48 }
 0x29f   :  { %4124 = vmatprep.subr.bf16.mxu1 %v5153_v2 }
 0x2a2   :  { %4126 = vmatpush3.bf16.msra.mxu1 %v5153_v2  ;;  %v4143_v2 = vpack.c.bf16 %v5251_v5, %v5246_v23  ;;  %v5884_v23 = vand.u32 4294901760, %v5137_v52  ;;  %v5885_v5 = vand.u32 4294901760, %v5139_v56 }
 0x2a3   :  { %4128 = vmatprep.subr.bf16.mxu1 %v5157_v20 }
 0x2a4   :  { %v4219_v59 = vpack.c.bf16 %v5885_v5, %v5884_v23 }
 0x2a5   :  { %3486 = vmatmul.mubr.f32.vlgmr.msra.gmra.mrb[4].mxu1 %v5199_v10 }
 0x2a6   :  { %3488 = vmatprep.mubr.f32.mxu1 %v5232_v58  ;;  %4130 = vmatpush3.bf16.msra.mxu1 %v5157_v20 }
 0x2a7   :  { %4132 = vmatprep.subr.bf16.mxu1 %v4131_v29 }
 0x2a9   :  { %3489 = vmatmul.mubr.f32.gmra.mrb[6].mxu1 %v5224_v35 }
 0x2aa   :  { %4134 = vmatpush3.bf16.msra.mxu1 %v4131_v29  ;;  %3523 = vmatprep.mubr.f32.mxu1 %v5220_v28  ;;  %v5871_v28 = vand.u32 4294901760, %v5075_v50  ;;  %v5876_v50 = vand.u32 4294901760, %v5191_v22  ;;  %v5880_v22 = vand.u32 4294901760, %v5113_v38  ;;  %v5405_v38 = vld [vmem:[#allocation2 + $0x128] sm:$0xff] }
 0x2ab   :  { %4136 = vmatprep.subr.bf16.mxu1 %v4135_v61  ;;  %v1941_v52 = vand.u32 4294901760, %v5405_v38 }
 0x2ac   :  { %v4191_v20 = vpack.c.bf16 %v5871_v28, %v1127_v4  ;;  %v4199_v4 = vpack.c.bf16 %v5876_v50, %v5875_v45 }
 0x2ae   :  { %4138 = vmatpush3.bf16.msra.mxu1 %v4135_v61 }
 0x2af   :  { %4140 = vmatprep.subr.bf16.mxu1 %v4139_v14 }
 0x2b2   :  { %4142 = vmatpush3.bf16.msra.mxu1 %v4139_v14  ;;  %v2817_v14 = vsel %vm1821_vm7, 1.0, %v5886_v44 }
 0x2b3   :  { %4144 = vmatprep.subr.bf16.mxu1 %v4143_v2 }
 0x2b6   :  { %4146 = vmatpush3.bf16.msra.mxu1 %v4143_v2 }
 0x2b7   :  { %4148 = vmatprep.subr.bf16.mxu1 %v5161_v17 }
 0x2ba   :  { %4150 = vmatpush3.bf16.msra.mxu1 %v5161_v17  ;;  %v5872_v17 = vand.u32 4294901760, %v5174_v46  ;;  %v5878_v46 = vand.u32 4294901760, %v5208_v48  ;;  %v5882_v48 = vand.u32 4294901760, %v5122_v36 }
 0x2bb   :  { %4152 = vmatprep.subr.bf16.mxu1 %v5165_v54 }
 0x2be   :  { %4154 = vmatpush3.bf16.msra.mxu1 %v5165_v54  ;;  %v5873_v54 = vand.u32 4294901760, %v5179_v37  ;;  %v5879_v37 = vand.u32 4294901760, %v5213_v27  ;;  %v5883_v27 = vand.u32 4294901760, %v5124_v40 }
 0x2bf   :  { %4156 = vmatprep.subr.bf16.mxu1 %v5169_v8 }
 0x2c2   :  { %4158 = vmatpush3.bf16.msra.mxu1 %v5169_v8  ;;  %v4195_v8 = vpack.c.bf16 %v5873_v54, %v5872_v17 }
 0x2c3   :  { %4160 = vmatprep.subr.bf16.mxu1 %v4991_v32 }
 0x2c5   :  { %3524 = vmatmul.mubr.f32.vlgmr.msra.gmra.mrb[4].mxu1 %v5216_v42 }
 0x2c6   :  { %3526 = vmatprep.mubr.f32.mxu1 %v5254_v33  ;;  %4162 = vmatpush3.bf16.msra.mxu1 %v4991_v32  ;;  %v4203_v33 = vpack.c.bf16 %v5879_v37, %v5878_v46 }
 0x2c7   :  { %4164 = vmatprep.subr.bf16.mxu1 %v4999_v34 }
 0x2c9   :  { %3527 = vmatmul.mubr.f32.gmra.mrb[6].mxu1 %v5241_v53  ;;  %v4215_v53 = vpack.c.bf16 %v5883_v27, %v5882_v48 }
 0x2ca   :  { %4166 = vmatpush3.bf16.msra.mxu1 %v4999_v34  ;;  %3561 = vmatprep.mubr.f32.mxu1 %v1086_v55  ;;  %v5874_v55 = vand.u32 4294901760, %v5216_v42  ;;  %v5881_v42 = vand.u32 4294901760, %v5115_v31 }
 0x2cb   :  { %4168 = vmatprep.subr.bf16.mxu1 %v5012_v21 }
 0x2cc   :  { %v4211_v3 = vpack.c.bf16 %v5881_v42, %v5880_v22 }
 0x2ce   :  { %4170 = vmatpush3.bf16.msra.mxu1 %v5012_v21 }
 0x2cf   :  { %4172 = vmatprep.subr.bf16.mxu1 %v5026_v63 }
 0x2d2   :  { %4174 = vmatpush3.bf16.msra.mxu1 %v5026_v63 }
 0x2d3   :  { %4176 = vmatprep.subr.bf16.mxu1 %v5036_v19 }
 0x2d6   :  { %4178 = vmatpush3.bf16.msra.mxu1 %v5036_v19 }
 0x2d7   :  { %4180 = vmatprep.subr.bf16.mxu1 %v5061_v0 }
 0x2da   :  { %4182 = vmatpush3.bf16.msra.mxu1 %v5061_v0 }
 0x2db   :  { %4184 = vmatprep.subr.bf16.mxu1 %v5065_v47 }
 0x2de   :  { %4186 = vmatpush3.bf16.msra.mxu1 %v5065_v47 }
 0x2df   :  { %4188 = vmatprep.subr.bf16.mxu1 %v5083_v25 }
 0x2e2   :  { %4190 = vmatpush3.bf16.msra.mxu1 %v5083_v25 }
 0x2e3   :  { %4192 = vmatprep.subr.bf16.mxu1 %v4191_v20 }
 0x2e5   :  { %3562 = vmatmul.mubr.f32.vlgmr.msra.gmra.mrb[4].mxu1 %v5874_v55 }
 0x2e6   :  { %3564 = vmatprep.mubr.f32.mxu1 %v1106_v9  ;;  %4194 = vmatpush3.bf16.msra.mxu1 %v4191_v20 }
 0x2e7   :  { %4196 = vmatprep.subr.bf16.mxu1 %v4195_v8 }
 0x2e9   :  { %3565 = vmatmul.mubr.f32.gmra.mrb[6].mxu1 %v5877_v18 }
 0x2ea   :  { %4198 = vmatpush3.bf16.msra.mxu1 %v4195_v8  ;;  %3599 = vmatprep.mubr.f32.mxu1 %v5203_v13  ;;  %v2819_v8 = vsel %vm1823_vm8, 1.0, %v5886_v44 }
 0x2eb   :  { %4200 = vmatprep.subr.bf16.mxu1 %v4199_v4 }
 0x2ee   :  { %4202 = vmatpush3.bf16.msra.mxu1 %v4199_v4  ;;  %v2820_v4 = vsel %vm1824_vm9, 1.0, %v5886_v44 }
 0x2ef   :  { %4204 = vmatprep.subr.bf16.mxu1 %v4203_v33 }
 0x2f2   :  { %4206 = vmatpush3.bf16.msra.mxu1 %v4203_v33 }
 0x2f3   :  { %4208 = vmatprep.subr.bf16.mxu1 %v4207_v51 }
 0x2f6   :  { %4210 = vmatpush3.bf16.msra.mxu1 %v4207_v51 }
 0x2f7   :  { %4212 = vmatprep.subr.bf16.mxu1 %v4211_v3 }
 0x2fa   :  { %4214 = vmatpush3.bf16.msra.mxu1 %v4211_v3 }
 0x2fb   :  { %4216 = vmatprep.subr.bf16.mxu1 %v4215_v53 }
 0x2fe   :  { %4218 = vmatpush3.bf16.msra.mxu1 %v4215_v53 }
 0x2ff   :  { %4220 = vmatprep.subr.bf16.mxu1 %v4219_v59 }
 0x302   :  { %4222 = vmatpush3.bf16.msra.mxu1 %v4219_v59 }
 0x303   :  { %4224 = vmatprep.subr.bf16.mxu1 %v4991_v32 }
 0x305   :  { %3600 = vmatmul.mubr.f32.vlgmr.msra.gmra.mrb[4].mxu1 %v5199_v10 }
 0x306   :  { %3602 = vmatprep.mubr.f32.mxu1 %v5232_v58  ;;  %4226 = vmatpush3.bf16.msra.mxu1 %v4991_v32  ;;  %v5392_v32 = vld [vmem:[#allocation2 + $0x100] sm:$0xff] }
 0x307   :  { %4228 = vmatprep.subr.bf16.mxu1 %v4999_v34 }
 0x309   :  { %3603 = vmatmul.mubr.f32.gmra.mrb[6].mxu1 %v5224_v35 }
 0x30a   :  { %4230 = vmatpush3.bf16.msra.mxu1 %v4999_v34  ;;  %3637 = vmatprep.mubr.f32.mxu1 %v5203_v13  ;;  %v5394_v34 = vld [vmem:[#allocation2 + $0x108] sm:$0xff]  ;;  %v5424_v13 = vld [vmem:[#allocation2 + $0x138] sm:$0xff] }
 0x30b   :  { %4232 = vmatprep.subr.bf16.mxu1 %v5012_v21  ;;  %v1947_v9 = vand.u32 4294901760, %v5424_v13 }
 0x30e   :  { %4234 = vmatpush3.bf16.msra.mxu1 %v5012_v21  ;;  %v5396_v21 = vld [vmem:[#allocation2 + $0x110] sm:$0xff] }
 0x30f   :  { %4236 = vmatprep.subr.bf16.mxu1 %v5026_v63 }
 0x312   :  { %4238 = vmatpush3.bf16.msra.mxu1 %v5026_v63  ;;  %v1926_v63 = vand.u32 4294901760, %v5392_v32 }
 0x313   :  { %4240 = vmatprep.subr.bf16.mxu1 %v5036_v19 }
 0x316   :  { %4242 = vmatpush3.bf16.msra.mxu1 %v5036_v19  ;;  %v1929_v19 = vand.u32 4294901760, %v5394_v34 }
 0x317   :  { %4244 = vmatprep.subr.bf16.mxu1 %v5061_v0 }
 0x318   :  { %v5412_v36 = vpack.c.bf16 %v1929_v19, %v1926_v63 }
 0x31a   :  { %4246 = vmatpush3.bf16.msra.mxu1 %v5061_v0  ;;  %v5400_v0 = vld [vmem:[#allocation2 + $0x118] sm:$0xff]  ;;  %4256 = vmatprep.subr.bf16.mxu0 %v5412_v36 }
 0x31b   :  { %4248 = vmatprep.subr.bf16.mxu1 %v5065_v47  ;;  %v1935_v31 = vand.u32 4294901760, %v5400_v0  ;;  %4258 = vmatpush3.bf16.msra.mxu0 %v5412_v36 }
 0x31e   :  { %4250 = vmatpush3.bf16.msra.mxu1 %v5065_v47  ;;  %v1932_v47 = vand.u32 4294901760, %v5396_v21 }
 0x31f   :  { %4252 = vmatprep.subr.bf16.mxu1 %v5083_v25 }
 0x320   :  { %v5420_v56 = vpack.c.bf16 %v1935_v31, %v1932_v47 }
 0x322   :  { %4254 = vmatpush3.bf16.msra.mxu1 %v5083_v25  ;;  %v5403_v25 = vld [vmem:[#allocation2 + $0x120] sm:$0xff]  ;;  %4260 = vmatprep.subr.bf16.mxu0 %v5420_v56 }
 0x323   :  { %v1938_v40 = vand.u32 4294901760, %v5403_v25  ;;  %4262 = vmatpush3.bf16.msra.mxu0 %v5420_v56 }
 0x325   :  { %3638 = vmatmul.mubr.f32.vlgmr.msra.gmra.mrb[4].mxu1 %v5199_v10  ;;  %v5422_v10 = vld [vmem:[#allocation2 + $0x130] sm:$0xff] }
 0x326   :  { %3640 = vmatprep.mubr.f32.mxu1 %v5232_v58  ;;  %v1944_v58 = vand.u32 4294901760, %v5422_v10 }
 0x328   :  { %v5447_v24 = vpack.c.bf16 %v1947_v9, %v1944_v58 }
 0x329   :  { %3641 = vmatmul.mubr.f32.gmra.mrb[6].mxu1 %v5224_v35  ;;  %v5433_v35 = vpack.c.bf16 %v1941_v52, %v1938_v40 }
 0x32b   :  { %4264 = vmatprep.subr.bf16.mxu0 %v5433_v35 }
 0x32c   :  { %4266 = vmatpush3.bf16.msra.mxu0 %v5433_v35 }
 0x32d   :  { %4268 = vmatprep.subr.bf16.mxu0 %v5447_v24 }
 0x330   :  { %4270 = vmatpush3.bf16.msra.mxu0 %v5447_v24 }
 0x331   :  { %4272 = vmatprep.subr.bf16.mxu0 %v5457_v6 }
 0x334   :  { %4274 = vmatpush3.bf16.msra.mxu0 %v5457_v6 }
 0x3f8   :  { %v3639_v7 = vpop.f32.mrb[4].mxu1 }
 0x3f9   :  { %v4455_v29 = vadd.f32 %v3639_v7, %v2816_v62  ;;  %v1751_v61 = vpop.f32.mrb[5].mxu1 }
 0x3fa   :  { %v4456_v2 = vadd.f32 %v2816_v62, %v1751_v61 }
 0x3fb   :  { %v1834_v28 = vmul.f32 %v4455_v29, %v2818_v26 }
 0x3fc   :  { %v1833_v20 = vmul.f32 %v4456_v2, %v2817_v14  ;;  %v3642_v17 = vpop.f32.mrb[6].mxu1 }
 0x3fd   :  { %v1763_v54 = vpop.f32.mrb[7].mxu1  ;;  %v4457_v45 = vadd.f32 %v3642_v17, %v2816_v62 }
 0x3fe   :  { %v1837_v55 = vadd.f32 %v1834_v28, %v1833_v20  ;;  %v4458_v50 = vadd.f32 %v2816_v62, %v1763_v54 }
 0x3ff   :  { %v1836_v46 = vmul.f32 %v4457_v45, %v2820_v4 }
 0x400   :  { %v1835_v18 = vmul.f32 %v4458_v50, %v2819_v8 }
 0x402   :  { %v1838_v37 = vadd.f32 %v1837_v55, %v1835_v18 }
 0x404   :  { %v1839_v33 = vadd.f32 %v1838_v37, %v1836_v46 }
 0x406   :  { %v1840_v51 = vrot.slane %v1839_v33, 4 }
 0x408   :  { %v1841_v22 = vadd.f32 %v1840_v51, %v1839_v33 }
 0x40a   :  { %v1842_v42 = vrot.slane %v1841_v22, 2 }
 0x40c   :  { %v1843_v3 = vadd.f32 %v1842_v42, %v1841_v22 }
 0x40e   :  { %v1844_v48 = vrot.slane %v1843_v3, 1 }
 0x410   :  { %v1845_v27 = vadd.f32 %v1844_v48, %v1843_v3 }
 0x412   :  { %v1846_v53 = vmul.f32 0.125, %v1845_v27 }
 0x414   :  { %v1847_v23 = vsub.f32 %v4456_v2, %v1846_v53  ;;  %v1848_v5 = vsub.f32 %v4455_v29, %v1846_v53  ;;  %v1849_v59 = vsub.f32 %v4458_v50, %v1846_v53  ;;  %v1850_v16 = vsub.f32 %v4457_v45, %v1846_v53  ;;  %v1913_v53 = vld [vmem:[#allocation2 + $0x160] sm:$0xff] }
 0x416   :  { %v1851_v57 = vmul.f32 %v1847_v23, %v1847_v23  ;;  %v1852_v60 = vmul.f32 %v1848_v5, %v1848_v5  ;;  %v1853_v62 = vmul.f32 %v1849_v59, %v1849_v59  ;;  %v1854_v7 = vmul.f32 %v1850_v16, %v1850_v16 }
 0x418   :  { %v1855_v11 = vmul.f32 %v2817_v14, %v1851_v57  ;;  %v1856_v61 = vmul.f32 %v2818_v26, %v1852_v60  ;;  %v1857_v28 = vmul.f32 %v2819_v8, %v1853_v62  ;;  %v1858_v17 = vmul.f32 %v2820_v4, %v1854_v7  ;;  %v1911_v26 = vld [vmem:[#allocation2 + $0x150] sm:$0xff]  ;;  %v1912_v8 = vld [vmem:[#allocation2 + $0x158] sm:$0xff]  ;;  %v1914_v57 = vld [vmem:[#allocation2 + $0x168] sm:$0xff] }
 0x419   :  { %v1956_v4 = vand.u32 4294901760, %v1911_v26  ;;  %v1959_v48 = vand.u32 4294901760, %v1912_v8  ;;  %v1962_v60 = vand.u32 4294901760, %v1913_v53  ;;  %v1965_v62 = vand.u32 4294901760, %v1914_v57  ;;  %v1916_v7 = vld [vmem:[#allocation2 + $0x178] sm:$0xff] }
 0x41a   :  { %v1859_v20 = vadd.f32 %v1856_v61, %v1855_v11  ;;  %v1971_v61 = vand.u32 4294901760, %v1916_v7 }
 0x41b   :  { %v5473_v27 = vpack.c.bf16 %v1959_v48, %v1956_v4 }
 0x41c   :  { %v1860_v54 = vadd.f32 %v1859_v20, %v1857_v28 }
 0x41d   :  { %4276 = vmatprep.subr.bf16.mxu0 %v5473_v27 }
 0x41e   :  { %v1861_v55 = vadd.f32 %v1860_v54, %v1858_v17  ;;  %4278 = vmatpush3.bf16.msra.mxu0 %v5473_v27 }
 0x420   :  { %v1862_v18 = vrot.slane %v1861_v55, 4 }
 0x422   :  { %v1863_v46 = vadd.f32 %v1862_v18, %v1861_v55 }
 0x424   :  { %v1864_v37 = vrot.slane %v1863_v46, 2 }
 0x426   :  { %v1865_v33 = vadd.f32 %v1864_v37, %v1863_v46 }
 0x428   :  { %v1866_v51 = vrot.slane %v1865_v33, 1 }
 0x42a   :  { %v1867_v2 = vadd.f32 %v1866_v51, %v1865_v33 }
 0x42c   :  { %v1868_v29 = vmul.f32 0.125, %v1867_v2 }
 0x42e   :  { %v1869_v50 = vadd.f32 1e-05, %v1868_v29 }
 0x430   :  { %4534 = vrsqrt.f32 %v1869_v50 }
 0x43a   :  { %v4535_v45 = vpop.eup %4534 }
 0x43b   :  { %v1871_v22 = vmul.f32 %v4535_v45, %v1847_v23  ;;  %v1872_v42 = vmul.f32 %v4535_v45, %v1848_v5  ;;  %v1873_v3 = vmul.f32 %v4535_v45, %v1849_v59  ;;  %v1874_v14 = vmul.f32 %v4535_v45, %v1850_v16  ;;  %v1915_v16 = vld [vmem:[#allocation2 + $0x170] sm:$0xff] }
 0x43c   :  { %v5477_v23 = vpack.c.bf16 %v1965_v62, %v1962_v60  ;;  %v5482_v5 = vsub.f32 %v5392_v32, %v1926_v63  ;;  %v5487_v59 = vsub.f32 %v5394_v34, %v1929_v19  ;;  %v1968_v11 = vand.u32 4294901760, %v1915_v16 }
 0x43d   :  { %4536 = vtanh.f32 %v1871_v22 }
 0x43e   :  { %4538 = vtanh.f32 %v1872_v42  ;;  %4280 = vmatprep.subr.bf16.mxu0 %v5477_v23  ;;  %v5870_v28 = vand.u32 4294901760, %v5482_v5  ;;  %v5866_v20 = vand.u32 4294901760, %v5487_v59  ;;  %v5495_v32 = vpack.c.bf16 %v1971_v61, %v1968_v11 }
 0x43f   :  { %4540 = vtanh.f32 %v1873_v3  ;;  %4282 = vmatpush3.bf16.msra.mxu0 %v5477_v23  ;;  %v5531_v3 = vsub.f32 %v1911_v26, %v1956_v4 }
 0x440   :  { %4542 = vtanh.f32 %v1874_v14  ;;  %v2050_v34 = vsub.f32 %v5482_v5, %v5870_v28  ;;  %v2057_v63 = vsub.f32 %v5487_v59, %v5866_v20  ;;  %4284 = vmatprep.subr.bf16.mxu0 %v5495_v32  ;;  %v5533_v14 = vsub.f32 %v1912_v8, %v1959_v48 }
 0x442   :  { %v2051_v46 = vand.u32 4294901760, %v2050_v34  ;;  %v2058_v37 = vand.u32 4294901760, %v2057_v63  ;;  %v5861_v34 = vand.u32 4294901760, %v5531_v3  ;;  %v5860_v63 = vand.u32 4294901760, %v5533_v14 }
 0x443   :  { %4286 = vmatpush3.bf16.msra.mxu0 %v5495_v32 }
 0x444   :  { %v5518_v50 = vpack.c.bf16 %v2058_v37, %v2051_v46  ;;  %v5540_v46 = vsub.f32 %v1913_v53, %v1962_v60  ;;  %v5542_v37 = vsub.f32 %v1914_v57, %v1965_v62  ;;  %v5555_v57 = vsub.f32 %v1915_v16, %v1968_v11 }
 0x445   :  { %v5557_v60 = vsub.f32 %v1916_v7, %v1971_v61 }
 0x446   :  { %4288 = vmatprep.subr.bf16.mxu0 %v5518_v50  ;;  %v5859_v8 = vand.u32 4294901760, %v5540_v46  ;;  %v5858_v4 = vand.u32 4294901760, %v5542_v37 }
 0x447   :  { %v5493_v17 = vpop.eup %4536 }
 0x448   :  { %v5503_v19 = vpop.eup %4538  ;;  %v1879_v54 = vrot.slane %v5493_v17, 4  ;;  %v2141_v53 = vsub.f32 %v5542_v37, %v5858_v4 }
 0x449   :  { %v5507_v55 = vpop.eup %4540  ;;  %v1880_v18 = vrot.slane %v5503_v19, 4 }
 0x44a   :  { %v5511_v33 = vpop.eup %4542  ;;  %v1881_v51 = vrot.slane %v5507_v55, 4 }
 0x44b   :  { %v1886_v2 = vsel %vm1883_vm10, %v1879_v54, %v1880_v18  ;;  %v1882_v29 = vrot.slane %v5511_v33, 4 }
 0x44c   :  { %v1885_v45 = vsel %vm1883_vm10, %v1880_v18, %v1881_v51  ;;  %1888 = vrot.lane.b32.xlu0 %v1886_v2, %s4581_s0  ;;  %v2120_v18 = vsub.f32 %v5531_v3, %v5861_v34 }
 0x44d   :  { %1890 = vrot.lane.b32.xlu1 %v1885_v45, %s4581_s0  ;;  %v1884_v22 = vsel %vm1883_vm10, %v1881_v51, %v1882_v29  ;;  %v1887_v42 = vsel %vm1883_vm10, %v1882_v29, %v1879_v54  ;;  %v2127_v54 = vsub.f32 %v5533_v14, %v5860_v63  ;;  %v2134_v51 = vsub.f32 %v5540_v46, %v5859_v8 }
 0x44e   :  { %v2121_v26 = vand.u32 4294901760, %v2120_v18  ;;  %v2142_v29 = vand.u32 4294901760, %v2141_v53  ;;  %v5857_v45 = vand.u32 4294901760, %v5555_v57  ;;  %v5592_v53 = vsub.f32 %v5396_v21, %v1932_v47 }
 0x44f   :  { %v2128_v48 = vand.u32 4294901760, %v2127_v54  ;;  %v2135_v2 = vand.u32 4294901760, %v2134_v51  ;;  %v5575_v54 = vpack.c.bf16 %v5487_v59, %v5482_v5  ;;  %v5587_v51 = vpack.c.bf16 %v5557_v60, %v5555_v57 }
 0x450   :  { %1892 = vrot.lane.b32.xlu0 %v1884_v22, %s4581_s0  ;;  %v5856_v22 = vand.u32 4294901760, %v5557_v60  ;;  %v2148_v18 = vsub.f32 %v5555_v57, %v5857_v45 }
 0x451   :  { %1894 = vrot.lane.b32.xlu1 %v1887_v42, %s4581_s0  ;;  %v5559_v62 = vpack.c.bf16 %v2128_v48, %v2121_v26  ;;  %v5563_v42 = vpack.c.bf16 %v2142_v29, %v2135_v2  ;;  %v5579_v26 = vpack.c.bf16 %v5533_v14, %v5531_v3  ;;  %v5583_v48 = vpack.c.bf16 %v5542_v37, %v5540_v46 }
 0x452   :  { %v2155_v16 = vsub.f32 %v5557_v60, %v5856_v22  ;;  %v2149_v7 = vand.u32 4294901760, %v2148_v18  ;;  %v5597_v2 = vsub.f32 %v5400_v0, %v1935_v31  ;;  %v5865_v29 = vand.u32 4294901760, %v5592_v53 }
 0x454   :  { %v2156_v11 = vand.u32 4294901760, %v2155_v16  ;;  %v5864_v18 = vand.u32 4294901760, %v5597_v2  ;;  %v5604_v16 = vsub.f32 %v5403_v25, %v1938_v40  ;;  %v2064_v0 = vsub.f32 %v5592_v53, %v5865_v29 }
 0x456   :  { %v5571_v61 = vpack.c.bf16 %v2156_v11, %v2149_v7  ;;  %v5609_v7 = vsub.f32 %v5405_v38, %v1941_v52  ;;  %v2071_v31 = vsub.f32 %v5597_v2, %v5864_v18  ;;  %v5863_v40 = vand.u32 4294901760, %v5604_v16 }
 0x457   :  { %v5626_v52 = vsub.f32 %v5422_v10, %v1944_v58  ;;  %v2065_v8 = vand.u32 4294901760, %v2064_v0 }
 0x458   :  { %v5862_v22 = vand.u32 4294901760, %v5609_v7  ;;  %v2072_v63 = vand.u32 4294901760, %v2071_v31 }
 0x45a   :  { %v2085_v58 = vsub.f32 %v5609_v7, %v5862_v22 }
 0x45c   :  { %v2086_v29 = vand.u32 4294901760, %v2085_v58 }
 0x4be   :  { %v1889_v21 = vpop.permute.xlu0 %1888 }
 0x4bf   :  { %v1891_v47 = vpop.permute.xlu1 %1890  ;;  %v1896_v11 = vadd.f32 %v5493_v17, %v1889_v21  ;;  %v5631_v17 = vsub.f32 %v5424_v13, %v1947_v9  ;;  %v2078_v13 = vsub.f32 %v5604_v16, %v5863_v40  ;;  %v4291_v40 = vpack.c.bf16 %v2072_v63, %v2065_v8 }
 0x4c0   :  { %v1897_v25 = vadd.f32 %v5503_v19, %v1891_v47 }
 0x4c1   :  { %v5621_v38 = vand.u32 4294901760, %v1896_v11 }
 0x4c2   :  { %v5633_v21 = vand.u32 4294901760, %v1897_v25  ;;  %v1893_v45 = vpop.permute.xlu0 %1892 }
 0x4c3   :  { %v5636_v19 = vsub.f32 %v1896_v11, %v5621_v38  ;;  %v1895_v47 = vpop.permute.xlu1 %1894  ;;  %v1898_v4 = vadd.f32 %v5507_v55, %v1893_v45  ;;  %v5869_v55 = vand.u32 4294901760, %v5626_v52  ;;  %v5868_v45 = vand.u32 4294901760, %v5631_v17 }
 0x4c4   :  { %v5640_v34 = vsub.f32 %v1897_v25, %v5633_v21  ;;  %v1899_v10 = vadd.f32 %v5511_v33, %v1895_v47  ;;  %v5660_v33 = vsub.f32 %v5437_v49, %v1950_v30  ;;  %v5665_v25 = vsub.f32 %v5439_v12, %v1953_v43 }
 0x4c5   :  { %v5649_v9 = vand.u32 4294901760, %v1898_v4  ;;  %v2008_v11 = vand.u32 4294901760, %v5636_v19  ;;  %v2079_v30 = vand.u32 4294901760, %v2078_v13  ;;  %v2092_v43 = vsub.f32 %v5626_v52, %v5869_v55 }
 0x4c6   :  { %v5867_v0 = vand.u32 4294901760, %v5640_v34  ;;  %v5655_v31 = vand.u32 4294901760, %v1899_v10  ;;  %v2099_v63 = vsub.f32 %v5631_v17, %v5868_v45 }
 0x4c7   :  { %v5668_v47 = vsub.f32 %v1898_v4, %v5649_v9  ;;  %v2009_v22 = vsub.f32 %v5636_v19, %v2008_v11  ;;  %v2093_v45 = vand.u32 4294901760, %v2092_v43 }
 0x4c8   :  { %v2019_v18 = vsub.f32 %v5640_v34, %v5867_v0  ;;  %v5677_v49 = vsub.f32 %v1899_v10, %v5655_v31  ;;  %v2105_v0 = vand.u32 4294901760, %v5660_v33  ;;  %v2112_v10 = vand.u32 4294901760, %v5665_v25 }
 0x4c9   :  { %v2010_v20 = vand.u32 4294901760, %v2009_v22  ;;  %v2028_v12 = vand.u32 4294901760, %v5668_v47  ;;  %v2100_v28 = vand.u32 4294901760, %v2099_v63 }
 0x4ca   :  { %v2020_v8 = vand.u32 4294901760, %v2019_v18  ;;  %v2038_v4 = vand.u32 4294901760, %v5677_v49  ;;  %v4295_v18 = vpack.c.bf16 %v2086_v29, %v2079_v30 }
 0x4cb   :  { %3675 = vmatprep.mubr.f32.mxu0 %v2010_v20  ;;  %v2029_v22 = vsub.f32 %v5668_v47, %v2028_v12  ;;  %v2106_v20 = vsub.f32 %v5660_v33, %v2105_v0 }
 0x4cc   :  { %3676 = vmatmul.mubr.f32.vlgmr.msra.gmra.mrb[4].mxu0 %v2020_v8  ;;  %v2039_v13 = vsub.f32 %v5677_v49, %v2038_v4  ;;  %v2113_v8 = vsub.f32 %v5665_v25, %v2112_v10 }
 0x4cd   :  { %4290 = vmatpush3.bf16.msra.mxu0 %v5518_v50  ;;  %v2030_v58 = vand.u32 4294901760, %v2029_v22  ;;  %v4299_v50 = vpack.c.bf16 %v2100_v28, %v2093_v45  ;;  %v2107_v29 = vand.u32 4294901760, %v2106_v20  ;;  %v4323_v28 = vpack.c.bf16 %v5597_v2, %v5592_v53 }
 0x4ce   :  { %4292 = vmatprep.subr.bf16.mxu0 %v4291_v40  ;;  %v2040_v55 = vand.u32 4294901760, %v2039_v13  ;;  %v2114_v30 = vand.u32 4294901760, %v2113_v8  ;;  %v5897_v45 = vand.u32 4294901760, %v5533_v14 }
 0x4cf   :  { %3678 = vmatprep.mubr.f32.mxu0 %v2030_v58 }
 0x4d0   :  { %3679 = vmatmul.mubr.f32.gmra.mrb[6].mxu0 %v2040_v55  ;;  %v4303_v43 = vpack.c.bf16 %v2114_v30, %v2107_v29 }
 0x4d1   :  { %4294 = vmatpush3.bf16.msra.mxu0 %v4291_v40  ;;  %3713 = vmatprep.mubr.f32.mxu0 %v5621_v38  ;;  %v5890_v40 = vand.u32 4294901760, %v5597_v2 }
 0x4d2   :  { %4296 = vmatprep.subr.bf16.mxu0 %v4295_v18 }
 0x4d5   :  { %4298 = vmatpush3.bf16.msra.mxu0 %v4295_v18 }
 0x4d6   :  { %4300 = vmatprep.subr.bf16.mxu0 %v4299_v50 }
 0x4d9   :  { %4302 = vmatpush3.bf16.msra.mxu0 %v4299_v50 }
 0x4da   :  { %4304 = vmatprep.subr.bf16.mxu0 %v4303_v43 }
 0x4dd   :  { %4306 = vmatpush3.bf16.msra.mxu0 %v4303_v43 }
 0x4de   :  { %4308 = vmatprep.subr.bf16.mxu0 %v5559_v62 }
 0x4e1   :  { %4310 = vmatpush3.bf16.msra.mxu0 %v5559_v62  ;;  %v4327_v62 = vpack.c.bf16 %v5609_v7, %v5604_v16 }
 0x4e2   :  { %4312 = vmatprep.subr.bf16.mxu0 %v5563_v42 }
 0x4e5   :  { %4314 = vmatpush3.bf16.msra.mxu0 %v5563_v42  ;;  %v4331_v42 = vpack.c.bf16 %v5631_v17, %v5626_v52 }
 0x4e6   :  { %4316 = vmatprep.subr.bf16.mxu0 %v5571_v61 }
 0x4e9   :  { %4318 = vmatpush3.bf16.msra.mxu0 %v5571_v61  ;;  %v4335_v61 = vpack.c.bf16 %v5665_v25, %v5660_v33  ;;  %v5900_v33 = vand.u32 4294901760, %v5555_v57 }
 0x4ea   :  { %4320 = vmatprep.subr.bf16.mxu0 %v5575_v54 }
 0x4ec   :  { %3714 = vmatmul.mubr.f32.vlgmr.msra.gmra.mrb[4].mxu0 %v5633_v21 }
 0x4ed   :  { %3716 = vmatprep.mubr.f32.mxu0 %v5649_v9  ;;  %4322 = vmatpush3.bf16.msra.mxu0 %v5575_v54  ;;  %v5887_v54 = vand.u32 4294901760, %v5482_v5  ;;  %v5892_v5 = vand.u32 4294901760, %v5604_v16  ;;  %v4399_v16 = vpack.c.bf16 %v2112_v10, %v2105_v0  ;;  %v5901_v0 = vand.u32 4294901760, %v5557_v60 }
 0x4ee   :  { %4324 = vmatprep.subr.bf16.mxu0 %v4323_v28 }
 0x4ef   :  { %v4411_v25 = vpack.c.bf16 %v5901_v0, %v5900_v33 }
 0x4f0   :  { %3717 = vmatmul.mubr.f32.gmra.mrb[6].mxu0 %v5655_v31 }
 0x4f1   :  { %4326 = vmatpush3.bf16.msra.mxu0 %v4323_v28  ;;  %3751 = vmatprep.mubr.f32.mxu0 %v5636_v19 }
 0x4f2   :  { %4328 = vmatprep.subr.bf16.mxu0 %v4327_v62 }
 0x4f5   :  { %4330 = vmatpush3.bf16.msra.mxu0 %v4327_v62 }
 0x4f6   :  { %4332 = vmatprep.subr.bf16.mxu0 %v4331_v42 }
 0x4f9   :  { %4334 = vmatpush3.bf16.msra.mxu0 %v4331_v42 }
 0x4fa   :  { %4336 = vmatprep.subr.bf16.mxu0 %v4335_v61 }
 0x4fd   :  { %4338 = vmatpush3.bf16.msra.mxu0 %v4335_v61 }
 0x4fe   :  { %4340 = vmatprep.subr.bf16.mxu0 %v5579_v26 }
 0x501   :  { %4342 = vmatpush3.bf16.msra.mxu0 %v5579_v26  ;;  %v5888_v26 = vand.u32 4294901760, %v5487_v59  ;;  %v5893_v59 = vand.u32 4294901760, %v5609_v7  ;;  %v5896_v7 = vand.u32 4294901760, %v5531_v3 }
 0x502   :  { %4344 = vmatprep.subr.bf16.mxu0 %v5583_v48 }
 0x503   :  { %v4391_v55 = vpack.c.bf16 %v5893_v59, %v5892_v5 }
 0x505   :  { %4346 = vmatpush3.bf16.msra.mxu0 %v5583_v48  ;;  %v4383_v48 = vpack.c.bf16 %v5888_v26, %v5887_v54 }
 0x506   :  { %4348 = vmatprep.subr.bf16.mxu0 %v5587_v51 }
 0x509   :  { %4350 = vmatpush3.bf16.msra.mxu0 %v5587_v51  ;;  %v5889_v51 = vand.u32 4294901760, %v5592_v53  ;;  %v5895_v53 = vand.u32 4294901760, %v5631_v17  ;;  %v5899_v17 = vand.u32 4294901760, %v5542_v37 }
 0x50a   :  { %4352 = vmatprep.subr.bf16.mxu0 %v5412_v36 }
 0x50b   :  { %v4387_v19 = vpack.c.bf16 %v5890_v40, %v5889_v51 }
 0x50c   :  { %3752 = vmatmul.mubr.f32.vlgmr.msra.gmra.mrb[4].mxu0 %v5640_v34 }
 0x50d   :  { %3754 = vmatprep.mubr.f32.mxu0 %v5668_v47  ;;  %4354 = vmatpush3.bf16.msra.mxu0 %v5412_v36  ;;  %v4403_v47 = vpack.c.bf16 %v5897_v45, %v5896_v7 }
 0x50e   :  { %4356 = vmatprep.subr.bf16.mxu0 %v5420_v56 }
 0x510   :  { %3755 = vmatmul.mubr.f32.gmra.mrb[6].mxu0 %v5677_v49 }
 0x511   :  { %4358 = vmatpush3.bf16.msra.mxu0 %v5420_v56  ;;  %3789 = vmatprep.mubr.f32.mxu0 %v2008_v11  ;;  %v5891_v11 = vand.u32 4294901760, %v5640_v34  ;;  %v5894_v34 = vand.u32 4294901760, %v5626_v52  ;;  %v5898_v52 = vand.u32 4294901760, %v5540_v46 }
 0x512   :  { %4360 = vmatprep.subr.bf16.mxu0 %v5433_v35 }
 0x513   :  { %v4395_v2 = vpack.c.bf16 %v5895_v53, %v5894_v34  ;;  %v4407_v49 = vpack.c.bf16 %v5899_v17, %v5898_v52 }
 0x515   :  { %4362 = vmatpush3.bf16.msra.mxu0 %v5433_v35 }
 0x516   :  { %4364 = vmatprep.subr.bf16.mxu0 %v5447_v24 }
 0x519   :  { %4366 = vmatpush3.bf16.msra.mxu0 %v5447_v24 }
 0x51a   :  { %4368 = vmatprep.subr.bf16.mxu0 %v5457_v6 }
 0x51d   :  { %4370 = vmatpush3.bf16.msra.mxu0 %v5457_v6 }
 0x51e   :  { %4372 = vmatprep.subr.bf16.mxu0 %v5473_v27 }
 0x521   :  { %4374 = vmatpush3.bf16.msra.mxu0 %v5473_v27 }
 0x522   :  { %4376 = vmatprep.subr.bf16.mxu0 %v5477_v23 }
 0x525   :  { %4378 = vmatpush3.bf16.msra.mxu0 %v5477_v23 }
 0x526   :  { %4380 = vmatprep.subr.bf16.mxu0 %v5495_v32 }
 0x529   :  { %4382 = vmatpush3.bf16.msra.mxu0 %v5495_v32 }
 0x52a   :  { %4384 = vmatprep.subr.bf16.mxu0 %v4383_v48 }
 0x52c   :  { %3790 = vmatmul.mubr.f32.vlgmr.msra.gmra.mrb[4].mxu0 %v5891_v11 }
 0x52d   :  { %3792 = vmatprep.mubr.f32.mxu0 %v2028_v12  ;;  %4386 = vmatpush3.bf16.msra.mxu0 %v4383_v48 }
 0x52e   :  { %4388 = vmatprep.subr.bf16.mxu0 %v4387_v19 }
 0x530   :  { %3793 = vmatmul.mubr.f32.gmra.mrb[6].mxu0 %v2038_v4 }
 0x531   :  { %4390 = vmatpush3.bf16.msra.mxu0 %v4387_v19  ;;  %3827 = vmatprep.mubr.f32.mxu0 %v5621_v38 }
 0x532   :  { %4392 = vmatprep.subr.bf16.mxu0 %v4391_v55 }
 0x535   :  { %4394 = vmatpush3.bf16.msra.mxu0 %v4391_v55 }
 0x536   :  { %4396 = vmatprep.subr.bf16.mxu0 %v4395_v2 }
 0x539   :  { %4398 = vmatpush3.bf16.msra.mxu0 %v4395_v2 }
 0x53a   :  { %4400 = vmatprep.subr.bf16.mxu0 %v4399_v16 }
 0x53d   :  { %4402 = vmatpush3.bf16.msra.mxu0 %v4399_v16 }
 0x53e   :  { %4404 = vmatprep.subr.bf16.mxu0 %v4403_v47 }
 0x541   :  { %4406 = vmatpush3.bf16.msra.mxu0 %v4403_v47 }
 0x542   :  { %4408 = vmatprep.subr.bf16.mxu0 %v4407_v49 }
 0x545   :  { %4410 = vmatpush3.bf16.msra.mxu0 %v4407_v49 }
 0x546   :  { %4412 = vmatprep.subr.bf16.mxu0 %v4411_v25 }
 0x549   :  { %4414 = vmatpush3.bf16.msra.mxu0 %v4411_v25 }
 0x54a   :  { %4416 = vmatprep.subr.bf16.mxu0 %v5412_v36 }
 0x54c   :  { %3828 = vmatmul.mubr.f32.vlgmr.msra.gmra.mrb[4].mxu0 %v5633_v21 }
 0x54d   :  { %3830 = vmatprep.mubr.f32.mxu0 %v5649_v9  ;;  %4418 = vmatpush3.bf16.msra.mxu0 %v5412_v36  ;;  %v2706_v36 = vand.u32 7, %v5042_v41 }
 0x54e   :  { %4420 = vmatprep.subr.bf16.mxu0 %v5420_v56 }
 0x54f   :  { %vm2744_vm11 = vcmp.eq.s32.totalorder %v2706_v36, 0 }
 0x550   :  { %3831 = vmatmul.mubr.f32.gmra.mrb[6].mxu0 %v5655_v31 }
 0x551   :  { %4422 = vmatpush3.bf16.msra.mxu0 %v5420_v56  ;;  %3865 = vmatprep.mubr.f32.mxu0 %v5621_v38  ;;  %v2699_v56 = vand.u32 7, %v4615_v1 }
 0x552   :  { %4424 = vmatprep.subr.bf16.mxu0 %v5433_v35 }
 0x553   :  { %vm2743_vm12 = vcmp.eq.s32.totalorder %v2699_v56, 0 }
 0x554   :  { %v2823_v14 = vsel %vm2743_vm12, 1.0, %v5886_v44 }
 0x555   :  { %4426 = vmatpush3.bf16.msra.mxu0 %v5433_v35  ;;  %v2822_v35 = vld [vmem:[%s5837_s2 + $0x2] ss:$0 sm:$0xff] }
 0x556   :  { %4428 = vmatprep.subr.bf16.mxu0 %v5447_v24 }
 0x559   :  { %4430 = vmatpush3.bf16.msra.mxu0 %v5447_v24  ;;  %v2713_v24 = vand.u32 7, %v5047_v39 }
 0x55a   :  { %4432 = vmatprep.subr.bf16.mxu0 %v5457_v6 }
 0x55b   :  { %vm2745_vm13 = vcmp.eq.s32.totalorder %v2713_v24, 0 }
 0x55c   :  { %v2825_v60 = vsel %vm2745_vm13, 1.0, %v5886_v44 }
 0x55d   :  { %4434 = vmatpush3.bf16.msra.mxu0 %v5457_v6 }
 0x55e   :  { %4436 = vmatprep.subr.bf16.mxu0 %v5473_v27 }
 0x561   :  { %4438 = vmatpush3.bf16.msra.mxu0 %v5473_v27  ;;  %v2824_v27 = vsel %vm2744_vm11, 1.0, %v5886_v44 }
 0x562   :  { %4440 = vmatprep.subr.bf16.mxu0 %v5477_v23 }
 0x565   :  { %4442 = vmatpush3.bf16.msra.mxu0 %v5477_v23  ;;  %v2720_v23 = vand.u32 7, %v5053_v15 }
 0x566   :  { %4444 = vmatprep.subr.bf16.mxu0 %v5495_v32 }
 0x567   :  { %vm2746_vm14 = vcmp.eq.s32.totalorder %v2720_v23, 0 }
 0x569   :  { %4446 = vmatpush3.bf16.msra.mxu0 %v5495_v32 }
 0x56c   :  { %3866 = vmatmul.mubr.f32.vlgmr.msra.gmra.mrb[4].mxu0 %v5633_v21 }
 0x56d   :  { %3868 = vmatprep.mubr.f32.mxu0 %v5649_v9  ;;  %v2826_v9 = vsel %vm2746_vm14, 1.0, %v5886_v44 }
 0x570   :  { %3869 = vmatmul.mubr.f32.gmra.mrb[6].mxu0 %v5655_v31 }
 0x63f   :  { %v3867_v6 = vpop.f32.mrb[4].mxu0 }
 0x640   :  { %v4459_v32 = vadd.f32 %v3867_v6, %v2822_v35  ;;  %v2673_v3 = vpop.f32.mrb[5].mxu0 }
 0x641   :  { %v4460_v41 = vadd.f32 %v2822_v35, %v2673_v3 }
 0x642   :  { %v2756_v1 = vmul.f32 %v4459_v32, %v2824_v27 }
 0x643   :  { %v2755_v46 = vmul.f32 %v4460_v41, %v2823_v14  ;;  %v3870_v37 = vpop.f32.mrb[6].mxu0 }
 0x644   :  { %v2685_v57 = vpop.f32.mrb[7].mxu0  ;;  %v4461_v39 = vadd.f32 %v3870_v37, %v2822_v35 }
 0x645   :  { %v2759_v38 = vadd.f32 %v2756_v1, %v2755_v46  ;;  %v4462_v21 = vadd.f32 %v2822_v35, %v2685_v57 }
 0x646   :  { %v2758_v15 = vmul.f32 %v4461_v39, %v2826_v9 }
 0x647   :  { %v2757_v31 = vmul.f32 %v4462_v21, %v2825_v60 }
 0x649   :  { %v2760_v12 = vadd.f32 %v2759_v38, %v2757_v31 }
 0x64b   :  { %v2761_v63 = vadd.f32 %v2760_v12, %v2758_v15 }
 0x64d   :  { %v2762_v4 = vrot.slane %v2761_v63, 4 }
 0x64f   :  { %v2763_v10 = vadd.f32 %v2762_v4, %v2761_v63 }
 0x651   :  { %v2764_v22 = vrot.slane %v2763_v10, 2 }
 0x653   :  { %v2765_v13 = vadd.f32 %v2764_v22, %v2763_v10 }
 0x655   :  { %v2766_v58 = vrot.slane %v2765_v13, 1 }
 0x657   :  { %v2767_v18 = vadd.f32 %v2766_v58, %v2765_v13 }
 0x659   :  { %v2768_v20 = vmul.f32 0.25, %v2767_v18 }
 0x65b   :  { %v2769_v8 = vsub.f32 %v4460_v41, %v2768_v20  ;;  %v2770_v50 = vsub.f32 %v4459_v32, %v2768_v20  ;;  %v2771_v29 = vsub.f32 %v4462_v21, %v2768_v20  ;;  %v2772_v30 = vsub.f32 %v4461_v39, %v2768_v20 }
 0x65d   :  { %v2773_v43 = vmul.f32 %v2769_v8, %v2769_v8  ;;  %v2774_v28 = vmul.f32 %v2770_v50, %v2770_v50  ;;  %v2775_v62 = vmul.f32 %v2771_v29, %v2771_v29  ;;  %v2776_v42 = vmul.f32 %v2772_v30, %v2772_v30 }
 0x65f   :  { %v2777_v44 = vmul.f32 %v2823_v14, %v2773_v43  ;;  %v2778_v61 = vmul.f32 %v2824_v27, %v2774_v28  ;;  %v2779_v54 = vmul.f32 %v2825_v60, %v2775_v62  ;;  %v2780_v48 = vmul.f32 %v2826_v9, %v2776_v42 }
 0x661   :  { %v2781_v26 = vadd.f32 %v2778_v61, %v2777_v44 }
 0x663   :  { %v2782_v51 = vadd.f32 %v2781_v26, %v2779_v54 }
 0x665   :  { %v2783_v40 = vadd.f32 %v2782_v51, %v2780_v48 }
 0x667   :  { %v2784_v19 = vrot.slane %v2783_v40, 4 }
 0x669   :  { %v2785_v11 = vadd.f32 %v2784_v19, %v2783_v40 }
 0x66b   :  { %v2786_v5 = vrot.slane %v2785_v11, 2 }
 0x66d   :  { %v2787_v59 = vadd.f32 %v2786_v5, %v2785_v11 }
 0x66f   :  { %v2788_v55 = vrot.slane %v2787_v59, 1 }
 0x671   :  { %v2789_v34 = vadd.f32 %v2788_v55, %v2787_v59 }
 0x673   :  { %v2790_v53 = vmul.f32 0.25, %v2789_v34 }
 0x675   :  { %v2791_v2 = vadd.f32 1e-05, %v2790_v53 }
 0x677   :  { %4544 = vrsqrt.f32 %v2791_v2 }
 0x681   :  { %v4545_v16 = vpop.eup %4544 }
 0x682   :  { %v2793_v7 = vmul.f32 %v4545_v16, %v2769_v8  ;;  %v2794_v45 = vmul.f32 %v4545_v16, %v2770_v50  ;;  %v2795_v47 = vmul.f32 %v4545_v16, %v2771_v29  ;;  %v2796_v52 = vmul.f32 %v4545_v16, %v2772_v30 }
 0x684   :  { %4546 = vtanh.f32 %v2793_v7 }
 0x685   :  { %4548 = vtanh.f32 %v2794_v45 }
 0x686   :  { %4550 = vtanh.f32 %v2795_v47 }
 0x687   :  { %4552 = vtanh.f32 %v2796_v52 }
 0x68e   :  { %v4547_v17 = vpop.eup %4546 }
 0x68f   :  { %v4549_v49 = vpop.eup %4548  ;;  %2801 = vst [vmem:[%s5838_s3] sm:$0xff] %v4547_v17 }
 0x690   :  { %v4551_v33 = vpop.eup %4550  ;;  %2802 = vst [vmem:[%s5838_s3 + $0x8] sm:$0xff] %v4549_v49 }
 0x691   :  { %v4553_v0 = vpop.eup %4552  ;;  %2803 = vst [vmem:[%s5838_s3 + $0x10] sm:$0xff] %v4551_v33 }
 0x692   :  { %2804 = vst [vmem:[%s5838_s3 + $0x18] sm:$0xff] %v4553_v0 }
 0x693   :  { %2809 = vsyncpa [#allocation3], 1 }

</bundles_post_ra>
